<compile_context>
chip_gen: v7x
topology: tpu7x:2x2x1
jax: 0.10.0
libtpu: 0.0.40
codegen_flags: <defaults>
</compile_context>

<pallas_src>
import jax
import jax.numpy as jnp
from jax import lax
from jax.experimental import pallas as pl
from jax.experimental.pallas import tpu as pltpu


def _round_up(n, m):
    return ((n + m - 1) // m) * m


def _pad2(arr, rows, cols):
    return jnp.pad(arr, ((0, rows - arr.shape[0]), (0, cols - arr.shape[1])))


def _transporter_kernel(x_ref,
                        we1_ref, be1_ref, we2_ref, be2_ref,      # VAE encoder
                        wi_ref, bi_ref, u_ref, a_ref,            # ICNN transport (cond-selected)
                        wd1_ref, bd1_ref, wd2_ref, bd2_ref,      # VAE decoder
                        out_ref):
    mm_dtype = we1_ref.dtype     # bf16 by default, f32 optional; f32 accumulation always

    def mm(lhs, w_ref):          # (tb, K) @ (K, N) on the MXU, f32 accumulate
        return jnp.dot(lhs.astype(mm_dtype), w_ref[...],
                       preferred_element_type=jnp.float32)

    x = x_ref[...].astype(jnp.float32)

    # ---- vae.encode: Linear -> ReLU -> Linear ----
    h = jnp.maximum(mm(x, we1_ref) + be1_ref[...], 0.0)
    z = mm(h, we2_ref) + be2_ref[...]

    # ---- ICNN OT transport: T(z) = grad psi(z) = a*z + W^T (sigmoid(Wz+b) * u) ----
    pre = mm(z, wi_ref) + bi_ref[...]                         # (tb, Hi)
    sig = pl.reciprocal(1.0 + jnp.exp(-pre), approx=True)     # exp + rcp on the EUP slot
    gated = (sig * u_ref[...]).astype(mm_dtype)               # u >= 0; zero in padded lanes
    # Contract over Hi directly -- no in-kernel transpose of W.
    back = lax.dot_general(gated, wi_ref[...],
                           dimension_numbers=(((1,), (1,)), ((), ())),
                           preferred_element_type=jnp.float32)  # (tb, Dz)
    t = a_ref[0, 0] * z + back

    # ---- vae.decode: Linear -> ReLU -> Linear ----
    hd = jnp.maximum(mm(t, wd1_ref) + bd1_ref[...], 0.0)
    y = mm(hd, wd2_ref) + bd2_ref[...]

    out_ref[...] = y.astype(out_ref.dtype)


def transporter_forward(x, enc_params, icnn_params, dec_params, cond_idx, *,
                        tb=256, matmul_dtype=jnp.bfloat16):
    """x: (B, D_in) float32. icnn_params hold K condition-specific transport maps.

    The batch tile `tb` is rounded to a multiple of 8 and capped at the padded batch;
    feature dims are zero-padded to multiples of 128 so every matmul N-dim and the
    output store are lane-dense. Matmul operands are cast to `matmul_dtype` (bf16 by
    default) with f32 accumulation; elementwise work stays f32 (v5e-safe).
    """
    B, D_in = x.shape
    we1, be1, we2, be2 = enc_params
    wd1, bd1, wd2, bd2 = dec_params
    wi_all, bi_all, u_all, a_all = icnn_params     # stacked over K conditions

    # model_dict[cond_idx]: select the conditional ICNN parameters (glue, plain JAX).
    wi = wi_all[cond_idx]
    bi = bi_all[cond_idx]
    u = jax.nn.softplus(u_all[cond_idx])           # enforce u >= 0 (ICNN convexity)
    a = a_all[cond_idx]

    H, Dz, Hi, Hd = we1.shape[1], we2.shape[1], wi.shape[1], wd1.shape[1]

    # Lane-dense padding: every feature dim -> multiple of 128.
    Dp = _round_up(D_in, 128)
    Hp = _round_up(H, 128)
    Zp = _round_up(Dz, 128)
    Ip = _round_up(Hi, 128)
    Gp = _round_up(Hd, 128)

    # Batch tile: multiple of 8 sublanes, no larger than the padded batch.
    tb = _round_up(max(8, min(tb, _round_up(B, 8))), 8)
    Bp = _round_up(B, tb)
    grid = (pl.cdiv(Bp, tb),)

    f32 = jnp.float32
    xw = _pad2(x.astype(f32), Bp, Dp)
    we1p = _pad2(we1, Dp, Hp).astype(matmul_dtype)
    be1p = _pad2(be1, 1, Hp).astype(f32)
    we2p = _pad2(we2, Hp, Zp).astype(matmul_dtype)
    be2p = _pad2(be2, 1, Zp).astype(f32)
    wip = _pad2(wi, Zp, Ip).astype(matmul_dtype)
    bip = _pad2(bi, 1, Ip).astype(f32)
    up = _pad2(u, 1, Ip).astype(f32)               # pad AFTER softplus -> padded lanes inert
    wd1p = _pad2(wd1, Zp, Gp).astype(matmul_dtype)
    bd1p = _pad2(bd1, 1, Gp).astype(f32)
    wd2p = _pad2(wd2, Gp, Dp).astype(matmul_dtype)
    bd2p = _pad2(bd2, 1, Dp).astype(f32)
    a_sc = a.reshape(1, 1).astype(f32)             # scalar -> SMEM (no (8,128) VMEM tile)

    args = (xw, we1p, be1p, we2p, be2p, wip, bip, up, a_sc, wd1p, bd1p, wd2p, bd2p)

    # TODO(synk): at real gene-expression scales (D_in in the thousands) the D_in-sized
    # weights (we1, wd2) should be streamed over an extra grid axis / manual DMA rather
    # than held whole in VMEM (v7x has only 64 MiB of VMEM).
    def run(weight_pipeline_mode):
        if weight_pipeline_mode is None:
            def wspec(r, c):
                return pl.BlockSpec((r, c), lambda i: (0, 0))
        else:
            def wspec(r, c):
                return pl.BlockSpec((r, c), lambda i: (0, 0),
                                    pipeline_mode=weight_pipeline_mode)
        return pl.pallas_call(
            _transporter_kernel,
            out_shape=jax.ShapeDtypeStruct((Bp, Dp), x.dtype),
            grid_spec=pltpu.PrefetchScalarGridSpec(
                num_scalar_prefetch=0,
                grid=grid,
                in_specs=[
                    pl.BlockSpec((tb, Dp), lambda i: (i, 0)),           # x batch tile
                    wspec(Dp, Hp), wspec(1, Hp),                        # encoder L1
                    wspec(Hp, Zp), wspec(1, Zp),                        # encoder L2
                    wspec(Zp, Ip), wspec(1, Ip), wspec(1, Ip),          # ICNN W, b, u
                    pl.BlockSpec(memory_space=pltpu.MemorySpace.SMEM),  # ICNN scalar a
                    wspec(Zp, Gp), wspec(1, Gp),                        # decoder L1
                    wspec(Gp, Dp), wspec(1, Dp),                        # decoder L2
                ],
                out_specs=pl.BlockSpec((tb, Dp), lambda i: (i, 0)),
            ),
            compiler_params=pltpu.CompilerParams(
                dimension_semantics=("parallel",),       # batch axis megacore-shardable
                vmem_limit_bytes=48 * 1024 * 1024),      # safe on v5e/v6e/v7x
        )(*args)

    try:
        # Resident weights (constant block index) only need a single buffer.
        out = run(pl.Buffered(1))
    except Exception:
        # TODO(synk): fall back to default double-buffering if this jax build rejects
        # pipeline_mode=pl.Buffered(1) on pallas_call BlockSpecs.
        out = run(None)

    return out[:B, :D_in]


def _reference(x, enc_params, icnn_params, dec_params, cond_idx):
    we1, be1, we2, be2 = enc_params
    wd1, bd1, wd2, bd2 = dec_params
    wi = icnn_params[0][cond_idx]
    bi = icnn_params[1][cond_idx]
    u = jax.nn.softplus(icnn_params[2][cond_idx])
    a = icnn_params[3][cond_idx]
    hp = "highest"
    h = jnp.maximum(jnp.dot(x, we1, precision=hp) + be1, 0.0)
    z = jnp.dot(h, we2, precision=hp) + be2
    sig = jax.nn.sigmoid(jnp.dot(z, wi, precision=hp) + bi)
    t = a[0, 0] * z + jnp.dot(sig * u, wi.T, precision=hp)
    hd = jnp.maximum(jnp.dot(t, wd1, precision=hp) + bd1, 0.0)
    return jnp.dot(hd, wd2, precision=hp) + bd2


if __name__ == "__main__":
    key = jax.random.PRNGKey(0)
    B, D_in, H, Dz, Hi, Hd, K = 24, 32, 32, 16, 32, 32, 3   # K conditions in model_dict
    ks = jax.random.split(key, 16)

    x = jax.random.normal(ks[0], (B, D_in), jnp.float32)

    enc_params = (
        jax.random.normal(ks[1], (D_in, H), jnp.float32) * 0.1,
        jax.random.normal(ks[2], (1, H), jnp.float32) * 0.1,
        jax.random.normal(ks[3], (H, Dz), jnp.float32) * 0.1,
        jax.random.normal(ks[4], (1, Dz), jnp.float32) * 0.1,
    )
    icnn_params = (
        jax.random.normal(ks[5], (K, Dz, Hi), jnp.float32) * 0.1,
        jax.random.normal(ks[6], (K, 1, Hi), jnp.float32) * 0.1,
        jax.random.normal(ks[7], (K, 1, Hi), jnp.float32) * 0.1,
        jnp.abs(jax.random.normal(ks[8], (K, 1, 1), jnp.float32)) + 0.5,
    )
    dec_params = (
        jax.random.normal(ks[9], (Dz, Hd), jnp.float32) * 0.1,
        jax.random.normal(ks[10], (1, Hd), jnp.float32) * 0.1,
        jax.random.normal(ks[11], (Hd, D_in), jnp.float32) * 0.1,
        jax.random.normal(ks[12], (1, D_in), jnp.float32) * 0.1,
    )

    cond_idx = 1
    y_ref = _reference(x, enc_params, icnn_params, dec_params, cond_idx)

    # f32 MXU path, multi-step grid with a zero-padded tail tile (B=24, tb=16 -> 2 steps).
    y32 = transporter_forward(x, enc_params, icnn_params, dec_params, cond_idx,
                              tb=16, matmul_dtype=jnp.float32)
    y32 = jax.block_until_ready(y32)
    assert y32.shape == (B, D_in)
    assert jnp.allclose(y32, y_ref, atol=1e-2, rtol=1e-2), \
        float(jnp.max(jnp.abs(y32 - y_ref)))

    # Default path: single large batch tile (capped at padded batch), bf16 MXU operands.
    ybf = transporter_forward(x, enc_params, icnn_params, dec_params, cond_idx)
    ybf = jax.block_until_ready(ybf)
    assert ybf.shape == (B, D_in)
    assert jnp.allclose(ybf, y_ref, atol=5e-2, rtol=5e-2), \
        float(jnp.max(jnp.abs(ybf - y_ref)))

    print("KERNEL_OK")
</pallas_src>

<mosaic_0001>
module attributes {stable_mosaic.version = 11 : i64} {
  func.func @_transporter_kernel(%arg0: i32, %arg1: memref<16x128xf32, #tpu.memory_space<vmem>>, %arg2: memref<128x128xf32, #tpu.memory_space<vmem>>, %arg3: memref<1x128xf32, #tpu.memory_space<vmem>>, %arg4: memref<128x128xf32, #tpu.memory_space<vmem>>, %arg5: memref<1x128xf32, #tpu.memory_space<vmem>>, %arg6: memref<128x128xf32, #tpu.memory_space<vmem>>, %arg7: memref<1x128xf32, #tpu.memory_space<vmem>>, %arg8: memref<1x128xf32, #tpu.memory_space<vmem>>, %arg9: memref<1x1xf32, #tpu.memory_space<smem>>, %arg10: memref<128x128xf32, #tpu.memory_space<vmem>>, %arg11: memref<1x128xf32, #tpu.memory_space<vmem>>, %arg12: memref<128x128xf32, #tpu.memory_space<vmem>>, %arg13: memref<1x128xf32, #tpu.memory_space<vmem>>, %arg14: memref<16x128xf32, #tpu.memory_space<vmem>>) attributes {dimension_semantics = [#tpu.dimension_semantics<parallel>], iteration_bounds = array<i64: 2>, scalar_prefetch = 0 : i64, scratch_operands = 0 : i64, tpu.core_type = #tpu.core_type<tc>, window_params = [{transform_indices = @transform_0, window_bounds = array<i64: 16, 128>}, {pipeline_mode = #tpu.pipeline_mode<synchronous>, transform_indices = @transform_1, window_bounds = array<i64: 128, 128>}, {pipeline_mode = #tpu.pipeline_mode<synchronous>, transform_indices = @transform_2, window_bounds = array<i64: 1, 128>}, {pipeline_mode = #tpu.pipeline_mode<synchronous>, transform_indices = @transform_3, window_bounds = array<i64: 128, 128>}, {pipeline_mode = #tpu.pipeline_mode<synchronous>, transform_indices = @transform_4, window_bounds = array<i64: 1, 128>}, {pipeline_mode = #tpu.pipeline_mode<synchronous>, transform_indices = @transform_5, window_bounds = array<i64: 128, 128>}, {pipeline_mode = #tpu.pipeline_mode<synchronous>, transform_indices = @transform_6, window_bounds = array<i64: 1, 128>}, {pipeline_mode = #tpu.pipeline_mode<synchronous>, transform_indices = @transform_7, window_bounds = array<i64: 1, 128>}, {transform_indices = @transform_8, window_bounds = array<i64: 1, 1>}, {pipeline_mode = #tpu.pipeline_mode<synchronous>, transform_indices = @transform_9, window_bounds = array<i64: 128, 128>}, {pipeline_mode = #tpu.pipeline_mode<synchronous>, transform_indices = @transform_10, window_bounds = array<i64: 1, 128>}, {pipeline_mode = #tpu.pipeline_mode<synchronous>, transform_indices = @transform_11, window_bounds = array<i64: 128, 128>}, {pipeline_mode = #tpu.pipeline_mode<synchronous>, transform_indices = @transform_12, window_bounds = array<i64: 1, 128>}, {transform_indices = @transform_13, window_bounds = array<i64: 16, 128>}]} {
    %c0 = arith.constant 0 : index
    %c0_0 = arith.constant 0 : index
    %0 = vector.load %arg1[%c0, %c0_0] : memref<16x128xf32, #tpu.memory_space<vmem>>, vector<16x128xf32>
    %c0_1 = arith.constant 0 : index
    %c0_2 = arith.constant 0 : index
    %1 = vector.load %arg2[%c0_1, %c0_2] : memref<128x128xf32, #tpu.memory_space<vmem>>, vector<128x128xf32>
    %cst = arith.constant dense<0.000000e+00> : vector<16x128xf32>
    %2 = tpu.matmul %0, %1, %cst {dimension_numbers = #tpu.dot_dimension_numbers<[1], [0], [0], [1], [0, 0, 1, 1], [], []>} : vector<16x128xf32>, vector<128x128xf32>, vector<16x128xf32> -> vector<16x128xf32>
    %c0_3 = arith.constant 0 : index
    %c0_4 = arith.constant 0 : index
    %3 = vector.load %arg3[%c0_3, %c0_4] : memref<1x128xf32, #tpu.memory_space<vmem>>, vector<1x128xf32>
    %4 = vector.broadcast %3 : vector<1x128xf32> to vector<16x128xf32>
    %5 = arith.addf %2, %4 : vector<16x128xf32>
    %cst_5 = arith.constant 0.000000e+00 : f32
    %6 = vector.broadcast %cst_5 : f32 to vector<16x128xf32>
    %7 = arith.maximumf %5, %6 : vector<16x128xf32>
    %c0_6 = arith.constant 0 : index
    %c0_7 = arith.constant 0 : index
    %8 = vector.load %arg4[%c0_6, %c0_7] : memref<128x128xf32, #tpu.memory_space<vmem>>, vector<128x128xf32>
    %cst_8 = arith.constant dense<0.000000e+00> : vector<16x128xf32>
    %9 = tpu.matmul %7, %8, %cst_8 {dimension_numbers = #tpu.dot_dimension_numbers<[1], [0], [0], [1], [0, 0, 1, 1], [], []>} : vector<16x128xf32>, vector<128x128xf32>, vector<16x128xf32> -> vector<16x128xf32>
    %c0_9 = arith.constant 0 : index
    %c0_10 = arith.constant 0 : index
    %10 = vector.load %arg5[%c0_9, %c0_10] : memref<1x128xf32, #tpu.memory_space<vmem>>, vector<1x128xf32>
    %11 = vector.broadcast %10 : vector<1x128xf32> to vector<16x128xf32>
    %12 = arith.addf %9, %11 : vector<16x128xf32>
    %c0_11 = arith.constant 0 : index
    %c0_12 = arith.constant 0 : index
    %13 = vector.load %arg6[%c0_11, %c0_12] : memref<128x128xf32, #tpu.memory_space<vmem>>, vector<128x128xf32>
    %cst_13 = arith.constant dense<0.000000e+00> : vector<16x128xf32>
    %14 = tpu.matmul %12, %13, %cst_13 {dimension_numbers = #tpu.dot_dimension_numbers<[1], [0], [0], [1], [0, 0, 1, 1], [], []>} : vector<16x128xf32>, vector<128x128xf32>, vector<16x128xf32> -> vector<16x128xf32>
    %c0_14 = arith.constant 0 : index
    %c0_15 = arith.constant 0 : index
    %15 = vector.load %arg7[%c0_14, %c0_15] : memref<1x128xf32, #tpu.memory_space<vmem>>, vector<1x128xf32>
    %16 = vector.broadcast %15 : vector<1x128xf32> to vector<16x128xf32>
    %17 = arith.addf %14, %16 : vector<16x128xf32>
    %cst_16 = arith.constant 0.000000e+00 : f32
    %18 = vector.broadcast %cst_16 : f32 to vector<16x128xf32>
    %19 = arith.subf %18, %17 : vector<16x128xf32>
    %20 = math.exp %19 : vector<16x128xf32>
    %cst_17 = arith.constant 1.000000e+00 : f32
    %21 = vector.broadcast %cst_17 : f32 to vector<16x128xf32>
    %22 = arith.addf %21, %20 : vector<16x128xf32>
    %23 = tpu.reciprocal %22 {approx = true} : vector<16x128xf32> -> vector<16x128xf32>
    %c0_18 = arith.constant 0 : index
    %c0_19 = arith.constant 0 : index
    %24 = vector.load %arg8[%c0_18, %c0_19] : memref<1x128xf32, #tpu.memory_space<vmem>>, vector<1x128xf32>
    %25 = vector.broadcast %24 : vector<1x128xf32> to vector<16x128xf32>
    %26 = arith.mulf %23, %25 : vector<16x128xf32>
    %c0_20 = arith.constant 0 : index
    %c0_21 = arith.constant 0 : index
    %27 = vector.load %arg6[%c0_20, %c0_21] : memref<128x128xf32, #tpu.memory_space<vmem>>, vector<128x128xf32>
    %cst_22 = arith.constant dense<0.000000e+00> : vector<16x128xf32>
    %28 = tpu.matmul %26, %27, %cst_22 {dimension_numbers = #tpu.dot_dimension_numbers<[1], [1], [0], [0], [0, 0, 1, 0], [], []>} : vector<16x128xf32>, vector<128x128xf32>, vector<16x128xf32> -> vector<16x128xf32>
    %c0_23 = arith.constant 0 : index
    %c0_24 = arith.constant 0 : index
    %29 = memref.load %arg9[%c0_23, %c0_24] : memref<1x1xf32, #tpu.memory_space<smem>>
    %30 = vector.broadcast %29 : f32 to vector<16x128xf32>
    %31 = arith.mulf %30, %12 : vector<16x128xf32>
    %32 = arith.addf %31, %28 : vector<16x128xf32>
    %c0_25 = arith.constant 0 : index
    %c0_26 = arith.constant 0 : index
    %33 = vector.load %arg10[%c0_25, %c0_26] : memref<128x128xf32, #tpu.memory_space<vmem>>, vector<128x128xf32>
    %cst_27 = arith.constant dense<0.000000e+00> : vector<16x128xf32>
    %34 = tpu.matmul %32, %33, %cst_27 {dimension_numbers = #tpu.dot_dimension_numbers<[1], [0], [0], [1], [0, 0, 1, 1], [], []>} : vector<16x128xf32>, vector<128x128xf32>, vector<16x128xf32> -> vector<16x128xf32>
    %c0_28 = arith.constant 0 : index
    %c0_29 = arith.constant 0 : index
    %35 = vector.load %arg11[%c0_28, %c0_29] : memref<1x128xf32, #tpu.memory_space<vmem>>, vector<1x128xf32>
    %36 = vector.broadcast %35 : vector<1x128xf32> to vector<16x128xf32>
    %37 = arith.addf %34, %36 : vector<16x128xf32>
    %cst_30 = arith.constant 0.000000e+00 : f32
    %38 = vector.broadcast %cst_30 : f32 to vector<16x128xf32>
    %39 = arith.maximumf %37, %38 : vector<16x128xf32>
    %c0_31 = arith.constant 0 : index
    %c0_32 = arith.constant 0 : index
    %40 = vector.load %arg12[%c0_31, %c0_32] : memref<128x128xf32, #tpu.memory_space<vmem>>, vector<128x128xf32>
    %cst_33 = arith.constant dense<0.000000e+00> : vector<16x128xf32>
    %41 = tpu.matmul %39, %40, %cst_33 {dimension_numbers = #tpu.dot_dimension_numbers<[1], [0], [0], [1], [0, 0, 1, 1], [], []>} : vector<16x128xf32>, vector<128x128xf32>, vector<16x128xf32> -> vector<16x128xf32>
    %c0_34 = arith.constant 0 : index
    %c0_35 = arith.constant 0 : index
    %42 = vector.load %arg13[%c0_34, %c0_35] : memref<1x128xf32, #tpu.memory_space<vmem>>, vector<1x128xf32>
    %43 = vector.broadcast %42 : vector<1x128xf32> to vector<16x128xf32>
    %44 = arith.addf %41, %43 : vector<16x128xf32>
    %c0_36 = arith.constant 0 : index
    %c0_37 = arith.constant 0 : index
    %45 = vector.load %arg14[%c0_36, %c0_37] : memref<16x128xf32, #tpu.memory_space<vmem>>, vector<16x128xf32>
    tpu.vector_store %arg14[%c0_36, %c0_37], %44 {strides = array<i32>} : memref<16x128xf32, #tpu.memory_space<vmem>>, vector<16x128xf32>,
    return
  }
  func.func @transform_0(%arg0: i32) -> (i32, i32) {
    %c0_i32 = arith.constant 0 : i32
    %c0_i32_0 = arith.constant 0 : i32
    return %arg0, %c0_i32 : i32, i32
  }
  func.func @transform_1(%arg0: i32) -> (i32, i32) {
    %c0_i32 = arith.constant 0 : i32
    %c0_i32_0 = arith.constant 0 : i32
    %c0_i32_1 = arith.constant 0 : i32
    return %c0_i32, %c0_i32_0 : i32, i32
  }
  func.func @transform_2(%arg0: i32) -> (i32, i32) {
    %c0_i32 = arith.constant 0 : i32
    %c0_i32_0 = arith.constant 0 : i32
    %c0_i32_1 = arith.constant 0 : i32
    return %c0_i32, %c0_i32_0 : i32, i32
  }
  func.func @transform_3(%arg0: i32) -> (i32, i32) {
    %c0_i32 = arith.constant 0 : i32
    %c0_i32_0 = arith.constant 0 : i32
    %c0_i32_1 = arith.constant 0 : i32
    return %c0_i32, %c0_i32_0 : i32, i32
  }
  func.func @transform_4(%arg0: i32) -> (i32, i32) {
    %c0_i32 = arith.constant 0 : i32
    %c0_i32_0 = arith.constant 0 : i32
    %c0_i32_1 = arith.constant 0 : i32
    return %c0_i32, %c0_i32_0 : i32, i32
  }
  func.func @transform_5(%arg0: i32) -> (i32, i32) {
    %c0_i32 = arith.constant 0 : i32
    %c0_i32_0 = arith.constant 0 : i32
    %c0_i32_1 = arith.constant 0 : i32
    return %c0_i32, %c0_i32_0 : i32, i32
  }
  func.func @transform_6(%arg0: i32) -> (i32, i32) {
    %c0_i32 = arith.constant 0 : i32
    %c0_i32_0 = arith.constant 0 : i32
    %c0_i32_1 = arith.constant 0 : i32
    return %c0_i32, %c0_i32_0 : i32, i32
  }
  func.func @transform_7(%arg0: i32) -> (i32, i32) {
    %c0_i32 = arith.constant 0 : i32
    %c0_i32_0 = arith.constant 0 : i32
    %c0_i32_1 = arith.constant 0 : i32
    return %c0_i32, %c0_i32_0 : i32, i32
  }
  func.func @transform_8(%arg0: i32) -> (i32, i32) {
    %c0_i32 = arith.constant 0 : i32
    %c0_i32_0 = arith.constant 0 : i32
    %c0_i32_1 = arith.constant 0 : i32
    return %c0_i32, %c0_i32_0 : i32, i32
  }
  func.func @transform_9(%arg0: i32) -> (i32, i32) {
    %c0_i32 = arith.constant 0 : i32
    %c0_i32_0 = arith.constant 0 : i32
    %c0_i32_1 = arith.constant 0 : i32
    return %c0_i32, %c0_i32_0 : i32, i32
  }
  func.func @transform_10(%arg0: i32) -> (i32, i32) {
    %c0_i32 = arith.constant 0 : i32
    %c0_i32_0 = arith.constant 0 : i32
    %c0_i32_1 = arith.constant 0 : i32
    return %c0_i32, %c0_i32_0 : i32, i32
  }
  func.func @transform_11(%arg0: i32) -> (i32, i32) {
    %c0_i32 = arith.constant 0 : i32
    %c0_i32_0 = arith.constant 0 : i32
    %c0_i32_1 = arith.constant 0 : i32
    return %c0_i32, %c0_i32_0 : i32, i32
  }
  func.func @transform_12(%arg0: i32) -> (i32, i32) {
    %c0_i32 = arith.constant 0 : i32
    %c0_i32_0 = arith.constant 0 : i32
    %c0_i32_1 = arith.constant 0 : i32
    return %c0_i32, %c0_i32_0 : i32, i32
  }
  func.func @transform_13(%arg0: i32) -> (i32, i32) {
    %c0_i32 = arith.constant 0 : i32
    %c0_i32_0 = arith.constant 0 : i32
    return %arg0, %c0_i32 : i32, i32
  }
}

module attributes {stable_mosaic.version = 11 : i64} {
  func.func @_transporter_kernel(%arg0: i32, %arg1: memref<16x128xf32, #tpu.memory_space<vmem>>, %arg2: memref<128x128xf32, #tpu.memory_space<vmem>>, %arg3: memref<1x128xf32, #tpu.memory_space<vmem>>, %arg4: memref<128x128xf32, #tpu.memory_space<vmem>>, %arg5: memref<1x128xf32, #tpu.memory_space<vmem>>, %arg6: memref<128x128xf32, #tpu.memory_space<vmem>>, %arg7: memref<1x128xf32, #tpu.memory_space<vmem>>, %arg8: memref<1x128xf32, #tpu.memory_space<vmem>>, %arg9: memref<1x1xf32, #tpu.memory_space<smem>>, %arg10: memref<128x128xf32, #tpu.memory_space<vmem>>, %arg11: memref<1x128xf32, #tpu.memory_space<vmem>>, %arg12: memref<128x128xf32, #tpu.memory_space<vmem>>, %arg13: memref<1x128xf32, #tpu.memory_space<vmem>>, %arg14: memref<16x128xf32, #tpu.memory_space<vmem>>) attributes {dimension_semantics = [#tpu.dimension_semantics<parallel>], iteration_bounds = array<i64: 2>, scalar_prefetch = 0 : i64, scratch_operands = 0 : i64, tpu.core_type = #tpu.core_type<tc>, window_params = [{transform_indices = @transform_0, window_bounds = array<i64: 16, 128>}, {pipeline_mode = #tpu.pipeline_mode<synchronous>, transform_indices = @transform_1, window_bounds = array<i64: 128, 128>}, {pipeline_mode = #tpu.pipeline_mode<synchronous>, transform_indices = @transform_2, window_bounds = array<i64: 1, 128>}, {pipeline_mode = #tpu.pipeline_mode<synchronous>, transform_indices = @transform_3, window_bounds = array<i64: 128, 128>}, {pipeline_mode = #tpu.pipeline_mode<synchronous>, transform_indices = @transform_4, window_bounds = array<i64: 1, 128>}, {pipeline_mode = #tpu.pipeline_mode<synchronous>, transform_indices = @transform_5, window_bounds = array<i64: 128, 128>}, {pipeline_mode = #tpu.pipeline_mode<synchronous>, transform_indices = @transform_6, window_bounds = array<i64: 1, 128>}, {pipeline_mode = #tpu.pipeline_mode<synchronous>, transform_indices = @transform_7, window_bounds = array<i64: 1, 128>}, {transform_indices = @transform_8, window_bounds = array<i64: 1, 1>}, {pipeline_mode = #tpu.pipeline_mode<synchronous>, transform_indices = @transform_9, window_bounds = array<i64: 128, 128>}, {pipeline_mode = #tpu.pipeline_mode<synchronous>, transform_indices = @transform_10, window_bounds = array<i64: 1, 128>}, {pipeline_mode = #tpu.pipeline_mode<synchronous>, transform_indices = @transform_11, window_bounds = array<i64: 128, 128>}, {pipeline_mode = #tpu.pipeline_mode<synchronous>, transform_indices = @transform_12, window_bounds = array<i64: 1, 128>}, {transform_indices = @transform_13, window_bounds = array<i64: 16, 128>}]} {
    %c0 = arith.constant 0 : index
    %c0_0 = arith.constant 0 : index
    %0 = vector.load %arg1[%c0, %c0_0] : memref<16x128xf32, #tpu.memory_space<vmem>>, vector<16x128xf32>
    %c0_1 = arith.constant 0 : index
    %c0_2 = arith.constant 0 : index
    %1 = vector.load %arg2[%c0_1, %c0_2] : memref<128x128xf32, #tpu.memory_space<vmem>>, vector<128x128xf32>
    %cst = arith.constant dense<0.000000e+00> : vector<16x128xf32>
    %2 = tpu.matmul %0, %1, %cst {dimension_numbers = #tpu.dot_dimension_numbers<[1], [0], [0], [1], [0, 0, 1, 1], [], []>} : vector<16x128xf32>, vector<128x128xf32>, vector<16x128xf32> -> vector<16x128xf32>
    %c0_3 = arith.constant 0 : index
    %c0_4 = arith.constant 0 : index
    %3 = vector.load %arg3[%c0_3, %c0_4] : memref<1x128xf32, #tpu.memory_space<vmem>>, vector<1x128xf32>
    %4 = vector.broadcast %3 : vector<1x128xf32> to vector<16x128xf32>
    %5 = arith.addf %2, %4 : vector<16x128xf32>
    %cst_5 = arith.constant 0.000000e+00 : f32
    %6 = vector.broadcast %cst_5 : f32 to vector<16x128xf32>
    %7 = arith.maximumf %5, %6 : vector<16x128xf32>
    %c0_6 = arith.constant 0 : index
    %c0_7 = arith.constant 0 : index
    %8 = vector.load %arg4[%c0_6, %c0_7] : memref<128x128xf32, #tpu.memory_space<vmem>>, vector<128x128xf32>
    %cst_8 = arith.constant dense<0.000000e+00> : vector<16x128xf32>
    %9 = tpu.matmul %7, %8, %cst_8 {dimension_numbers = #tpu.dot_dimension_numbers<[1], [0], [0], [1], [0, 0, 1, 1], [], []>} : vector<16x128xf32>, vector<128x128xf32>, vector<16x128xf32> -> vector<16x128xf32>
    %c0_9 = arith.constant 0 : index
    %c0_10 = arith.constant 0 : index
    %10 = vector.load %arg5[%c0_9, %c0_10] : memref<1x128xf32, #tpu.memory_space<vmem>>, vector<1x128xf32>
    %11 = vector.broadcast %10 : vector<1x128xf32> to vector<16x128xf32>
    %12 = arith.addf %9, %11 : vector<16x128xf32>
    %c0_11 = arith.constant 0 : index
    %c0_12 = arith.constant 0 : index
    %13 = vector.load %arg6[%c0_11, %c0_12] : memref<128x128xf32, #tpu.memory_space<vmem>>, vector<128x128xf32>
    %cst_13 = arith.constant dense<0.000000e+00> : vector<16x128xf32>
    %14 = tpu.matmul %12, %13, %cst_13 {dimension_numbers = #tpu.dot_dimension_numbers<[1], [0], [0], [1], [0, 0, 1, 1], [], []>} : vector<16x128xf32>, vector<128x128xf32>, vector<16x128xf32> -> vector<16x128xf32>
    %c0_14 = arith.constant 0 : index
    %c0_15 = arith.constant 0 : index
    %15 = vector.load %arg7[%c0_14, %c0_15] : memref<1x128xf32, #tpu.memory_space<vmem>>, vector<1x128xf32>
    %16 = vector.broadcast %15 : vector<1x128xf32> to vector<16x128xf32>
    %17 = arith.addf %14, %16 : vector<16x128xf32>
    %cst_16 = arith.constant 0.000000e+00 : f32
    %18 = vector.broadcast %cst_16 : f32 to vector<16x128xf32>
    %19 = arith.subf %18, %17 : vector<16x128xf32>
    %20 = math.exp %19 : vector<16x128xf32>
    %cst_17 = arith.constant 1.000000e+00 : f32
    %21 = vector.broadcast %cst_17 : f32 to vector<16x128xf32>
    %22 = arith.addf %21, %20 : vector<16x128xf32>
    %23 = tpu.reciprocal %22 {approx = true} : vector<16x128xf32> -> vector<16x128xf32>
    %c0_18 = arith.constant 0 : index
    %c0_19 = arith.constant 0 : index
    %24 = vector.load %arg8[%c0_18, %c0_19] : memref<1x128xf32, #tpu.memory_space<vmem>>, vector<1x128xf32>
    %25 = vector.broadcast %24 : vector<1x128xf32> to vector<16x128xf32>
    %26 = arith.mulf %23, %25 : vector<16x128xf32>
    %c0_20 = arith.constant 0 : index
    %c0_21 = arith.constant 0 : index
    %27 = vector.load %arg6[%c0_20, %c0_21] : memref<128x128xf32, #tpu.memory_space<vmem>>, vector<128x128xf32>
    %cst_22 = arith.constant dense<0.000000e+00> : vector<16x128xf32>
    %28 = tpu.matmul %26, %27, %cst_22 {dimension_numbers = #tpu.dot_dimension_numbers<[1], [1], [0], [0], [0, 0, 1, 0], [], []>} : vector<16x128xf32>, vector<128x128xf32>, vector<16x128xf32> -> vector<16x128xf32>
    %c0_23 = arith.constant 0 : index
    %c0_24 = arith.constant 0 : index
    %29 = memref.load %arg9[%c0_23, %c0_24] : memref<1x1xf32, #tpu.memory_space<smem>>
    %30 = vector.broadcast %29 : f32 to vector<16x128xf32>
    %31 = arith.mulf %30, %12 : vector<16x128xf32>
    %32 = arith.addf %31, %28 : vector<16x128xf32>
    %c0_25 = arith.constant 0 : index
    %c0_26 = arith.constant 0 : index
    %33 = vector.load %arg10[%c0_25, %c0_26] : memref<128x128xf32, #tpu.memory_space<vmem>>, vector<128x128xf32>
    %cst_27 = arith.constant dense<0.000000e+00> : vector<16x128xf32>
    %34 = tpu.matmul %32, %33, %cst_27 {dimension_numbers = #tpu.dot_dimension_numbers<[1], [0], [0], [1], [0, 0, 1, 1], [], []>} : vector<16x128xf32>, vector<128x128xf32>, vector<16x128xf32> -> vector<16x128xf32>
    %c0_28 = arith.constant 0 : index
    %c0_29 = arith.constant 0 : index
    %35 = vector.load %arg11[%c0_28, %c0_29] : memref<1x128xf32, #tpu.memory_space<vmem>>, vector<1x128xf32>
    %36 = vector.broadcast %35 : vector<1x128xf32> to vector<16x128xf32>
    %37 = arith.addf %34, %36 : vector<16x128xf32>
    %cst_30 = arith.constant 0.000000e+00 : f32
    %38 = vector.broadcast %cst_30 : f32 to vector<16x128xf32>
    %39 = arith.maximumf %37, %38 : vector<16x128xf32>
    %c0_31 = arith.constant 0 : index
    %c0_32 = arith.constant 0 : index
    %40 = vector.load %arg12[%c0_31, %c0_32] : memref<128x128xf32, #tpu.memory_space<vmem>>, vector<128x128xf32>
    %cst_33 = arith.constant dense<0.000000e+00> : vector<16x128xf32>
    %41 = tpu.matmul %39, %40, %cst_33 {dimension_numbers = #tpu.dot_dimension_numbers<[1], [0], [0], [1], [0, 0, 1, 1], [], []>} : vector<16x128xf32>, vector<128x128xf32>, vector<16x128xf32> -> vector<16x128xf32>
    %c0_34 = arith.constant 0 : index
    %c0_35 = arith.constant 0 : index
    %42 = vector.load %arg13[%c0_34, %c0_35] : memref<1x128xf32, #tpu.memory_space<vmem>>, vector<1x128xf32>
    %43 = vector.broadcast %42 : vector<1x128xf32> to vector<16x128xf32>
    %44 = arith.addf %41, %43 : vector<16x128xf32>
    %c0_36 = arith.constant 0 : index
    %c0_37 = arith.constant 0 : index
    %45 = vector.load %arg14[%c0_36, %c0_37] : memref<16x128xf32, #tpu.memory_space<vmem>>, vector<16x128xf32>
    tpu.vector_store %arg14[%c0_36, %c0_37], %44 {strides = array<i32>} : memref<16x128xf32, #tpu.memory_space<vmem>>, vector<16x128xf32>,
    return
  }
  func.func @transform_0(%arg0: i32) -> (i32, i32) {
    %c0_i32 = arith.constant 0 : i32
    %c0_i32_0 = arith.constant 0 : i32
    return %arg0, %c0_i32 : i32, i32
  }
  func.func @transform_1(%arg0: i32) -> (i32, i32) {
    %c0_i32 = arith.constant 0 : i32
    %c0_i32_0 = arith.constant 0 : i32
    %c0_i32_1 = arith.constant 0 : i32
    return %c0_i32, %c0_i32_0 : i32, i32
  }
  func.func @transform_2(%arg0: i32) -> (i32, i32) {
    %c0_i32 = arith.constant 0 : i32
    %c0_i32_0 = arith.constant 0 : i32
    %c0_i32_1 = arith.constant 0 : i32
    return %c0_i32, %c0_i32_0 : i32, i32
  }
  func.func @transform_3(%arg0: i32) -> (i32, i32) {
    %c0_i32 = arith.constant 0 : i32
    %c0_i32_0 = arith.constant 0 : i32
    %c0_i32_1 = arith.constant 0 : i32
    return %c0_i32, %c0_i32_0 : i32, i32
  }
  func.func @transform_4(%arg0: i32) -> (i32, i32) {
    %c0_i32 = arith.constant 0 : i32
    %c0_i32_0 = arith.constant 0 : i32
    %c0_i32_1 = arith.constant 0 : i32
    return %c0_i32, %c0_i32_0 : i32, i32
  }
  func.func @transform_5(%arg0: i32) -> (i32, i32) {
    %c0_i32 = arith.constant 0 : i32
    %c0_i32_0 = arith.constant 0 : i32
    %c0_i32_1 = arith.constant 0 : i32
    return %c0_i32, %c0_i32_0 : i32, i32
  }
  func.func @transform_6(%arg0: i32) -> (i32, i32) {
    %c0_i32 = arith.constant 0 : i32
    %c0_i32_0 = arith.constant 0 : i32
    %c0_i32_1 = arith.constant 0 : i32
    return %c0_i32, %c0_i32_0 : i32, i32
  }
  func.func @transform_7(%arg0: i32) -> (i32, i32) {
    %c0_i32 = arith.constant 0 : i32
    %c0_i32_0 = arith.constant 0 : i32
    %c0_i32_1 = arith.constant 0 : i32
    return %c0_i32, %c0_i32_0 : i32, i32
  }
  func.func @transform_8(%arg0: i32) -> (i32, i32) {
    %c0_i32 = arith.constant 0 : i32
    %c0_i32_0 = arith.constant 0 : i32
    %c0_i32_1 = arith.constant 0 : i32
    return %c0_i32, %c0_i32_0 : i32, i32
  }
  func.func @transform_9(%arg0: i32) -> (i32, i32) {
    %c0_i32 = arith.constant 0 : i32
    %c0_i32_0 = arith.constant 0 : i32
    %c0_i32_1 = arith.constant 0 : i32
    return %c0_i32, %c0_i32_0 : i32, i32
  }
  func.func @transform_10(%arg0: i32) -> (i32, i32) {
    %c0_i32 = arith.constant 0 : i32
    %c0_i32_0 = arith.constant 0 : i32
    %c0_i32_1 = arith.constant 0 : i32
    return %c0_i32, %c0_i32_0 : i32, i32
  }
  func.func @transform_11(%arg0: i32) -> (i32, i32) {
    %c0_i32 = arith.constant 0 : i32
    %c0_i32_0 = arith.constant 0 : i32
    %c0_i32_1 = arith.constant 0 : i32
    return %c0_i32, %c0_i32_0 : i32, i32
  }
  func.func @transform_12(%arg0: i32) -> (i32, i32) {
    %c0_i32 = arith.constant 0 : i32
    %c0_i32_0 = arith.constant 0 : i32
    %c0_i32_1 = arith.constant 0 : i32
    return %c0_i32, %c0_i32_0 : i32, i32
  }
  func.func @transform_13(%arg0: i32) -> (i32, i32) {
    %c0_i32 = arith.constant 0 : i32
    %c0_i32_0 = arith.constant 0 : i32
    return %arg0, %c0_i32 : i32, i32
  }
}

</mosaic_0001>

<bundles_post_ra>
// kernel: tpu_custom_call.1
= control target key start
LH: loop header
LB: loop body
LE: loop exit
PB: predicated region body
PF: predicated region fallthrough
CT: control target
= control target key end

     0   :  { %s2606_s0 = inlined_call_operand.hbm [shape: f32[32,128], index: 0, kind: input, shape index: {}]   ;;  %s2607_s1 = inlined_call_operand.hbm [shape: f32[128,128], index: 1, kind: input, shape index: {}]   ;;  %s2608_s2 = inlined_call_operand.vmem [shape: f32[1,128], index: 2, kind: input, shape index: {}]   ;;  %s2609_s3 = inlined_call_operand.hbm [shape: f32[128,128], index: 3, kind: input, shape index: {}]   ;;  %s2610_s4 = inlined_call_operand.vmem [shape: f32[1,128], index: 4, kind: input, shape index: {}]   ;;  %s2611_s5 = inlined_call_operand.hbm [shape: f32[128,128], index: 5, kind: input, shape index: {}]   ;;  %s2612_s6 = inlined_call_operand.vmem [shape: f32[1,128], index: 6, kind: input, shape index: {}]   ;;  %s2613_s7 = inlined_call_operand.vmem [shape: f32[1,128], index: 7, kind: input, shape index: {}]   ;;  %s2614_s8 = inlined_call_operand.<no memory space> [shape: f32[1,1], index: 8, kind: input, shape index: {}]   ;;  %s2615_s9 = inlined_call_operand.hbm [shape: f32[128,128], index: 9, kind: input, shape index: {}]   ;;  %s2616_s10 = inlined_call_operand.vmem [shape: f32[1,128], index: 10, kind: input, shape index: {}]   ;;  %s2617_s11 = inlined_call_operand.hbm [shape: f32[128,128], index: 11, kind: input, shape index: {}]   ;;  %s2618_s12 = inlined_call_operand.vmem [shape: f32[1,128], index: 12, kind: input, shape index: {}]   ;;  %s2619_s13 = inlined_call_operand.hbm [shape: f32[32,128], index: 13, kind: output, shape index: {}]  }
   0x1   :  { %2625 = sst [smem:[#allocation20_spill]] %s2607_s1 }
   0x2   :  { %2626 = sst [smem:[#allocation21_spill]] %s2613_s7 }
   0x3   :  { %2627 = sst [smem:[#allocation22_spill]] %s2616_s10 }
   0x4   :  { %2628 = sst [smem:[#allocation23_spill]] %s2618_s12 }
   0x5   :  { %2629 = sst [smem:[#allocation24_spill]] %s2619_s13 }
   0x6   :  { %18 = sst [smem:[#allocation2]] %s2614_s8 }
   0x7   :  { %19 = vsyncpa [#allocation4], 0 }
   0x8   :  { %21 = vsyncpa [#allocation4 + $0x1], 0 }
   0x9   :  { %22 = vsyncpa [#allocation7], 0 }
   0xa   :  { %23 = vsyncpa [#allocation10], 0 }
   0xb   :  { %24 = vsyncpa [#allocation13], 0 }
   0xc   :  { %25 = vsyncpa [#allocation5], 0 }
   0xd   :  { %27 = vsyncpa [#allocation5 + $0x1], 0  ;;  %s2253_s27 = smov 0   ;;  %s2255_s28 = smov 0  }
   0xe   :  { %s2257_s29 = smov 0   ;;  %s2259_s30 = smov 0  }
   0xf LB: > { %s2169_s8 = smov [#allocation6]   ;;  %s2274_s15 = sadd.s32 4294967295, %s2167_s30   ;;  %s2167_s30 = sphi %s2259_s30, %s2657_s30   ;;  %s2163_s29 = sphi %s2257_s29, %s2656_s29   ;;  %s2159_s28 = sphi %s2255_s28, %s2655_s28   ;;  %s2155_s27 = sphi %s2253_s27, %s2654_s27  }
  0x10   : > { %s354_s14 = sshll.u32 %s2169_s8, 4  ;;  %p1269_p0 = scmp.ge.s32.totalorder %s2167_s30, 1  ;;  %s2279_s14 = int_to_ptr.vmem [resolvable:$true] %s354_s14 }
  0x11   : > { %p2621_p1 = scmp.eq.s32.totalorder %s2274_s15, 0  ;;  %p342_p2 = scmp.lt.s32.totalorder %s2167_s30, 3 }
  0x12   : > { %s2170_s17 = smov [#allocation9]   ;;  %s2171_s20 = smov [#allocation8]  }
  0x13   : > { %p2281_p3 = pnand %p1269_p0, %p342_p2  ;;  %s386_s18 = sshll.u32 %s2170_s17, 4  ;;  %s2294_s18 = int_to_ptr.vmem [resolvable:$true] %s386_s18 }
  0x14   : > { %s370_s21 = sshll.u32 %s2171_s20, 4  ;;  %s2632_s1 = sld [smem:[#allocation20_spill]]  ;;  %s2296_s21 = int_to_ptr.vmem [resolvable:$true] %s370_s21 }
  0x15   : > { %s2630_s16 = scalar_select %p2281_p3, 1, 0 }
  0x16   : > { %p1834_p5 = pneg %p2281_p3 }
  0x18   : > { %p2290_p6 = pnand %p1834_p5, %p2621_p1 }
  0x1a   : > { %s1919_s24 = scalar_lea.hbm %s2632_s1, 2048  ;;  %p2306_p8 = pneg %p2290_p6 }
  0x1b   : > { %p1920_p7 = scmp.ne.s32.totalorder %s2632_s1, %s1919_s24  ;;  %p1926_p11 = scmp.lt.u32.totalorder %s1919_s24, %s2632_s1 }
  0x1d   : > { %p1922_p9 = pnand %p2306_p8, %p1920_p7 }
  0x1f   : > { %p1923_p10 = pneg %p1922_p9 }
  0x21   : > { %p1928_p12 = pnand %p1926_p11, %p1923_p10 }
  0x23   : > { %1931 = shalt.err (!%p1928_p12)
}
  0x24   : > { %s1932_s22 = scalar_lea.vmem %s2279_s14, 2048  ;;  %p1940_p5 = scmp.lt.s32.totalorder %s2279_s14, %s2279_s14 }
  0x25   : > { %p1933_p13 = scmp.ne.s32.totalorder %s2279_s14, %s1932_s22  ;;  %p1941_p4 = scmp.lt.s32.totalorder %s1932_s22, %s1932_s22 }
  0x27   : > { %p1935_p0 = pnand %p1933_p13, %p2306_p8  ;;  %p1942_p7 = por %p1941_p4, %p1940_p5 }
  0x29   : > { %p1936_p2 = pneg %p1935_p0 }
  0x2b   : > { %p1943_p9 = pnand %p1942_p7, %p1936_p2 }
  0x2d   : > { %1946 = shalt.err (!%p1943_p9)
}
  0x2e   : > { %s2623_s23 = smov 128   ;;  %s2173_s24 = smov 8  }
  0x2f   : > { %1837 = dma.hbm_to_vmem [thread:$0]  (!%p2290_p6), %s2632_s1, 2048, %s2279_s14, [#allocation7], %s2623_s23, %s2623_s23, %s2173_s24  }
  0x30   : > { %s1947_s22 = scalar_lea.hbm %s2611_s5, 2048 }
  0x31   : > { %p1948_p4 = scmp.ne.s32.totalorder %s2611_s5, %s1947_s22  ;;  %p1954_p12 = scmp.lt.u32.totalorder %s1947_s22, %s2611_s5 }
  0x33   : > { %p1950_p10 = pnand %p1948_p4, %p2306_p8 }
  0x35   : > { %p1951_p11 = pneg %p1950_p10 }
  0x37   : > { %p1956_p13 = pnand %p1954_p12, %p1951_p11 }
  0x39   : > { %1959 = shalt.err (!%p1956_p13)
}
  0x3a   : > { %s1960_s14 = scalar_lea.vmem %s2294_s18, 2048  ;;  %p1968_p7 = scmp.lt.s32.totalorder %s2294_s18, %s2294_s18 }
  0x3b   : > { %p1961_p0 = scmp.ne.s32.totalorder %s2294_s18, %s1960_s14  ;;  %p1969_p9 = scmp.lt.s32.totalorder %s1960_s14, %s1960_s14 }
  0x3d   : > { %p1963_p2 = pnand %p1961_p0, %p2306_p8  ;;  %p1970_p4 = por %p1969_p9, %p1968_p7 }
  0x3f   : > { %p1964_p5 = pneg %p1963_p2 }
  0x41   : > { %p1971_p10 = pnand %p1970_p4, %p1964_p5 }
  0x43   : > { %1974 = shalt.err (!%p1971_p10)
}
  0x44   : > { %1843 = dma.hbm_to_vmem [thread:$0]  (!%p2290_p6), %s2611_s5, 2048, %s2294_s18, [#allocation10], %s2623_s23, %s2623_s23, %s2173_s24  }
  0x45   : > { %s1975_s25 = scalar_lea.hbm %s2609_s3, 2048 }
  0x46   : > { %p1976_p11 = scmp.ne.s32.totalorder %s2609_s3, %s1975_s25  ;;  %p1982_p0 = scmp.lt.u32.totalorder %s1975_s25, %s2609_s3 }
  0x48   : > { %p1978_p12 = pnand %p1976_p11, %p2306_p8 }
  0x4a   : > { %p1979_p13 = pneg %p1978_p12 }
  0x4c   : > { %p1984_p2 = pnand %p1982_p0, %p1979_p13 }
  0x4e   : > { %1987 = shalt.err (!%p1984_p2)
}
  0x4f   : > { %s1988_s18 = scalar_lea.vmem %s2296_s21, 2048  ;;  %p1996_p4 = scmp.lt.s32.totalorder %s2296_s21, %s2296_s21 }
  0x50   : > { %p1989_p5 = scmp.ne.s32.totalorder %s2296_s21, %s1988_s18  ;;  %p1997_p10 = scmp.lt.s32.totalorder %s1988_s18, %s1988_s18 }
  0x52   : > { %p1991_p7 = pnand %p1989_p5, %p2306_p8  ;;  %p1998_p11 = por %p1997_p10, %p1996_p4 }
  0x54   : > { %p1992_p9 = pneg %p1991_p7 }
  0x56   : > { %p1999_p12 = pnand %p1998_p11, %p1992_p9 }
  0x58   : > { %2002 = shalt.err (!%p1999_p12)
}
  0x59   : > { %1840 = dma.hbm_to_vmem [thread:$0]  (!%p2290_p6), %s2609_s3, 2048, %s2296_s21, [#allocation7], %s2623_s23, %s2623_s23, %s2173_s24  }
  0x5a   : > { %s2174_s10 = smov [#allocation11]   ;;  %s2175_s13 = smov [#allocation12]  }
  0x5b   : > { %s408_s12 = sshll.u32 %s2174_s10, 4  ;;  %s424_s25 = sshll.u32 %s2175_s13, 4  ;;  %s409_s12 = int_to_ptr.vmem [resolvable:$true] %s408_s12  ;;  %s425_s25 = int_to_ptr.vmem [resolvable:$true] %s424_s25 }
  0x5c   : > { %s2003_s20 = scalar_lea.hbm %s2615_s9, 2048 }
  0x5d   : > { %p2004_p13 = scmp.ne.s32.totalorder %s2615_s9, %s2003_s20  ;;  %p2010_p5 = scmp.lt.u32.totalorder %s2003_s20, %s2615_s9 }
  0x5f   : > { %p2006_p0 = pnand %p2004_p13, %p2306_p8 }
  0x61   : > { %p2007_p2 = pneg %p2006_p0 }
  0x63   : > { %p2012_p7 = pnand %p2010_p5, %p2007_p2 }
  0x65   : > { %2015 = shalt.err (!%p2012_p7)
}
  0x66   : > { %s2016_s21 = scalar_lea.vmem %s409_s12, 2048  ;;  %p2024_p11 = scmp.lt.s32.totalorder %s409_s12, %s409_s12 }
  0x67   : > { %p2017_p9 = scmp.ne.s32.totalorder %s409_s12, %s2016_s21  ;;  %p2025_p12 = scmp.lt.s32.totalorder %s2016_s21, %s2016_s21 }
  0x69   : > { %p2019_p4 = pnand %p2017_p9, %p2306_p8  ;;  %p2026_p1 = por %p2025_p12, %p2024_p11 }
  0x6b   : > { %p2020_p10 = pneg %p2019_p4 }
  0x6d   : > { %p2027_p3 = pnand %p2026_p1, %p2020_p10 }
  0x6f   : > { %2030 = shalt.err (!%p2027_p3)
}
  0x70   : > { %1846 = dma.hbm_to_vmem [thread:$0]  (!%p2290_p6), %s2615_s9, 2048, %s409_s12, [#allocation10], %s2623_s23, %s2623_s23, %s2173_s24  }
  0x71   : > { %s2031_s26 = scalar_lea.hbm %s2617_s11, 2048 }
  0x72   : > { %p2032_p1 = scmp.ne.s32.totalorder %s2617_s11, %s2031_s26  ;;  %p2038_p0 = scmp.lt.u32.totalorder %s2031_s26, %s2617_s11 }
  0x74   : > { %p2034_p3 = pnand %p2032_p1, %p2306_p8 }
  0x76   : > { %p2035_p13 = pneg %p2034_p3 }
  0x78   : > { %p2040_p2 = pnand %p2038_p0, %p2035_p13 }
  0x7a   : > { %2043 = shalt.err (!%p2040_p2)
}
  0x7b   : > { %s2044_s14 = scalar_lea.vmem %s425_s25, 2048  ;;  %p2052_p4 = scmp.lt.s32.totalorder %s425_s25, %s425_s25 }
  0x7c   : > { %p2045_p5 = scmp.ne.s32.totalorder %s425_s25, %s2044_s14  ;;  %p2053_p10 = scmp.lt.s32.totalorder %s2044_s14, %s2044_s14 }
  0x7e   : > { %p2047_p7 = pnand %p2045_p5, %p2306_p8  ;;  %p2054_p11 = por %p2053_p10, %p2052_p4 }
  0x80   : > { %p2048_p9 = pneg %p2047_p7 }
  0x82   : > { %p2055_p12 = pnand %p2054_p11, %p2048_p9 }
  0x84   : > { %2058 = shalt.err (!%p2055_p12)
}
  0x85   : > { %1849 = dma.hbm_to_vmem [thread:$0]  (!%p2290_p6), %s2617_s11, 2048, %s425_s25, [#allocation13], %s2623_s23, %s2623_s23, %s2173_s24  }
  0x86   : > { %s1268_s19 = sadd.s32 4294967294, %s2167_s30   ;;  %s2426_s8 = sadd.s32 1, %s2167_s30  }
  0x87   : > { %s40_s1 = sadd.s32 1, %s2163_s29  ;;  %s37_s7 = ssub.s32 %s2167_s30, %s2426_s8 }
  0x88   : > { %p47_p8 = scmp.ne.s32.totalorder %s2163_s29, %s2159_s28  ;;  %p38_p1 = scmp.eq.s32.totalorder %s37_s7, 0 }
  0x89   : > { %p48_p3 = scmp.eq.s32.totalorder %s2167_s30, 0  ;;  %p53_p13 = scmp.ne.s32.totalorder %s2159_s28, %s2155_s27 }
  0x8a   : > { %p329_p0 = scmp.eq.s32.totalorder %s2274_s15, 1  ;;  %p2634_p5 = scmp.eq.s32.totalorder %s2274_s15, 0 }
  0x8b   : > { %s2438_s10 = scalar_select %p38_p1, %s2163_s29, %s40_s1  }
  0x8c   : > { %p49_p2 = por %p48_p3, %p47_p8  ;;  %p2442_p7 = por %p2634_p5, %p53_p13 }
  0x8d   : > { %p2446_p6 = por %p329_p0, %p47_p8  ;;  %p335_p9 = scmp.eq.s32.totalorder %s1268_s19, 1 }
  0x8e   : > { %p1863_p4 = scmp.lt.s32.totalorder %s2167_s30, 2  ;;  %s441_s26 = sand.u32 1, %s2163_s29  }
  0x8f   : > { %s2636_s25 = scalar_select %p2446_p6, 1, 0 }
  0x90   : > { %p2452_p10 = por %p335_p9, %p53_p13  ;;  %s1276_s20 = sshll.u32 %s441_s26, 4 }
  0x91   : > { %s1298_s22 = sshll.u32 %s2167_s30, 8  ;;  %s445_s21 = scalar_lea.vmem [#allocation3], %s1276_s20 }
  0x92   : > { %s2637_s17 = scalar_select %p2452_p10, 1, 0 }
  0x93   : > { %s2460_s12 = scalar_lea.hbm %s2606_s0, %s1298_s22  ;;  %s452_s1 = sshll.u32 %s445_s21, 4  ;;  %s2466_s1 = int_to_ptr.vmem [resolvable:$true] %s452_s1 }
  0x94   : > { %p2462_p11 = pnand %p1863_p4, %p49_p2  ;;  %s2468_s7 = scalar_lea.sflag [#allocation4], %s441_s26 }
  0x95   : > { %s2059_s23 = scalar_lea.hbm %s2460_s12, 256  ;;  %s2064_s18 = scalar_lea.hbm %s2606_s0, 512 }
  0x96   : > { %p2060_p12 = scmp.ne.s32.totalorder %s2460_s12, %s2059_s23  ;;  %p2061_p8 = pneg %p2462_p11 }
  0x97   : > { %p2065_p13 = scmp.lt.u32.totalorder %s2460_s12, %s2606_s0  ;;  %p2066_p0 = scmp.lt.u32.totalorder %s2064_s18, %s2059_s23 }
  0x98   : > { %p2062_p1 = pnand %p2061_p8, %p2060_p12  ;;  %p2068_p5 = scmp.lt.u32.totalorder %s2059_s23, %s2460_s12 }
  0x99   : > { %p2067_p2 = por %p2066_p0, %p2065_p13 }
  0x9a   : > { %p2063_p3 = pneg %p2062_p1 }
  0x9b   : > { %p2069_p9 = por %p2068_p5, %p2067_p2 }
  0x9d   : > { %p2070_p4 = pnand %p2069_p9, %p2063_p3 }
  0x9f   : > { %2073 = shalt.err (!%p2070_p4)
}
  0xa0   : > { %s2074_s26 = scalar_lea.vmem %s2466_s1, 256  ;;  %s2176_s20 = smov [#allocation3]  }
  0xa1   : > { %p2075_p12 = scmp.ne.s32.totalorder %s2466_s1, %s2074_s26  ;;  %s2079_s22 = sshll.u32 %s2176_s20, 4  ;;  %s2080_s22 = int_to_ptr.vmem [resolvable:$false] %s2079_s22 }
  0xa2   : > { %s2081_s14 = scalar_lea.vmem %s2080_s22, 512  ;;  %p2082_p6 = scmp.lt.s32.totalorder %s2466_s1, %s2080_s22 }
  0xa3   : > { %p2077_p1 = pnand %p2075_p12, %p2061_p8  ;;  %p2083_p13 = scmp.lt.s32.totalorder %s2081_s14, %s2074_s26 }
  0xa5   : > { %p2078_p10 = pneg %p2077_p1  ;;  %p2084_p0 = por %p2083_p13, %p2082_p6 }
  0xa7   : > { %p2085_p2 = pnand %p2084_p0, %p2078_p10 }
  0xa9   : > { %2088 = shalt.err (!%p2085_p2)
}
  0xaa   : > { %s2639_s23 = smov 128   ;;  %p2640_p8 = scmp.ne.s32.totalorder %s2630_s16, 0 }
  0xab   : > { %1853 = dma.hbm_to_vmem [thread:$0]  (!%p2462_p11), %s2460_s12, 256, %s2466_s1, %s2468_s7, %s2639_s23, %s2639_s23, %s2173_s24  }
  0xac   : > { %464 = sbr.rel (%p2640_p8) target bundleno = 1569 (0x621), region = 72  ;;  %s2502_s18 = sand.u32 (!%p2640_p8), 1, %s2159_s28  }
  0xad   : > { %s1280_s21 = sshll.u32 (!%p2640_p8), %s2502_s18, 4  ;;  %s467_s26 = scalar_lea.sflag (!%p2640_p8), [#allocation4], %s2502_s18 }
  0xae   : > { %s2508_s19 = scalar_lea.vmem (!%p2640_p8), [#allocation3], %s1280_s21 }
  0xb3   : > { %2134 = dma.done.wait (%p2442_p7), %s467_s26, 256  }
  0xb4   : > { %2136 = vsyncadd (%p2442_p7), %s467_s26, 4294967040  ;;  %p2641_p6 = scmp.eq.s32.totalorder %s2274_s15, 0 }
  0xb6   : > { %2138 = dma.done.wait (%p2641_p6), [#allocation7], 4096   ;;  %p2642_p10 = pmov %p2641_p6 }
  0xb7   : > { %p2643_p11 = pmov %p2641_p6 }
  0xb8   : > { %2140 = vsyncadd (%p2642_p10), [#allocation7], 4294963200 }
  0xb9   : > { %2142 = dma.done.wait (%p2643_p11), [#allocation10], 4096   ;;  %p2644_p3 = pmov %p2641_p6 }
  0xbb   : > { %2144 = vsyncadd (%p2644_p3), [#allocation10], 4294963200  ;;  %p2645_p5 = pmov %p2644_p3 }
  0xbc   : > { %p2646_p9 = pmov %p2644_p3 }
  0xbd   : > { %2146 = dma.done.wait (%p2645_p5), [#allocation13], 2048  }
  0xbe   : > { %2148 = vsyncadd (%p2646_p9), [#allocation13], 4294965248  ;;  %v537_v0 = vld [vmem:[#allocation6] sm:$0xff]  ;;  %v538_v1 = vld [vmem:[#allocation6 + $0x8] sm:$0xff]  ;;  %s2647_s14 = sld [smem:[#allocation21_spill]]  ;;  %s927_s23 = sld [smem:[#allocation2]] }
  0xbf   : > { %v539_v2 = vld [vmem:[#allocation6 + $0x10] sm:$0xff]  ;;  %v1618_v3 = vpack.c.bf16 %v538_v1, %v537_v0  ;;  %v540_v4 = vld [vmem:[#allocation6 + $0x18] sm:$0xff]  ;;  %v541_v6 = vld [vmem:[#allocation6 + $0x20] sm:$0xff]  ;;  %s2648_s16 = sld [smem:[#allocation22_spill]]  ;;  %s532_s24 = scalar_lea.vmem [#allocation14], %s1280_s21 }
  0xc0   : > { %v1622_v5 = vpack.c.bf16 %v540_v4, %v539_v2  ;;  %v542_v7 = vld [vmem:[#allocation6 + $0x28] sm:$0xff]  ;;  %v543_v9 = vld [vmem:[#allocation6 + $0x30] sm:$0xff]  ;;  %v544_v10 = vld [vmem:[#allocation6 + $0x38] sm:$0xff]  ;;  %s1147_s13 = sshll.u32 %s532_s24, 4  ;;  %s2649_s7 = sld [smem:[#allocation23_spill]]  ;;  %s2557_s13 = int_to_ptr.vmem [resolvable:$true] %s1147_s13 }
  0xc1   : > { %1619 = vmatprep.subr.bf16.mxu0 %v1618_v3  ;;  %v1626_v8 = vpack.c.bf16 %v542_v7, %v541_v6  ;;  %v535_v11 = vld [vmem:[%s2508_s19] sm:$0xff]  ;;  %v638_v13 = vld [vmem:[#allocation8 + $0x8] sm:$0xff]  ;;  %v640_v16 = vld [vmem:[#allocation8 + $0x18] sm:$0xff]  ;;  %v1630_v20 = vpack.c.bf16 %v544_v10, %v543_v9  ;;  %s1299_s20 = sshll.u32 %s2274_s15, 8  ;;  %s1134_s21 = scalar_lea.sflag [#allocation5], %s2502_s18 }
  0xc2   : > { %1621 = vmatpush3.bf16.msra.mxu0 %v1618_v3  ;;  %1440 = vmatprep.mubr.f32.mxu0 %v535_v11  ;;  %v637_v12 = vld [vmem:[#allocation8] sm:$0xff]  ;;  %v639_v14 = vld [vmem:[#allocation8 + $0x10] sm:$0xff]  ;;  %v642_v19 = vld [vmem:[#allocation8 + $0x28] sm:$0xff]  ;;  %p2651_p4 = scmp.ne.s32.totalorder %s2636_s25, 0  ;;  %s2177_s15 = smov [#allocation14]  }
  0xc3   : > { %1623 = vmatprep.subr.bf16.mxu0 %v1622_v5  ;;  %v1650_v15 = vpack.c.bf16 %v638_v13, %v637_v12  ;;  %v1654_v17 = vpack.c.bf16 %v640_v16, %v639_v14  ;;  %v641_v18 = vld [vmem:[#allocation8 + $0x20] sm:$0xff]  ;;  %v546_v22 = vld [vmem:[#allocation6 + $0x48] sm:$0xff]  ;;  %v643_v24 = vld [vmem:[#allocation8 + $0x30] sm:$0xff] }
  0xc4   : > { %v545_v21 = vld [vmem:[#allocation6 + $0x40] sm:$0xff]  ;;  %v1658_v23 = vpack.c.bf16 %v642_v19, %v641_v18  ;;  %v644_v25 = vld [vmem:[#allocation8 + $0x38] sm:$0xff]  ;;  %v547_v27 = vld [vmem:[#allocation6 + $0x50] sm:$0xff] }
  0xc5   : > { %1651 = vmatprep.subr.bf16.mxu1 %v1650_v15  ;;  %v1634_v26 = vpack.c.bf16 %v546_v22, %v545_v21  ;;  %v548_v28 = vld [vmem:[#allocation6 + $0x58] sm:$0xff]  ;;  %v1662_v29 = vpack.c.bf16 %v644_v25, %v643_v24  ;;  %v645_v30 = vld [vmem:[#allocation8 + $0x40] sm:$0xff]  ;;  %v646_v31 = vld [vmem:[#allocation8 + $0x48] sm:$0xff] }
  0xc6   : > { %1625 = vmatpush3.bf16.msra.mxu0 %v1622_v5  ;;  %1653 = vmatpush3.bf16.msra.mxu1 %v1650_v15  ;;  %v1638_v32 = vpack.c.bf16 %v548_v28, %v547_v27  ;;  %v549_v33 = vld [vmem:[#allocation6 + $0x60] sm:$0xff]  ;;  %v550_v34 = vld [vmem:[#allocation6 + $0x68] sm:$0xff]  ;;  %v1666_v35 = vpack.c.bf16 %v646_v31, %v645_v30  ;;  %v647_v36 = vld [vmem:[#allocation8 + $0x50] sm:$0xff] }
  0xc7   : > { %1627 = vmatprep.subr.bf16.mxu0 %v1626_v8  ;;  %1655 = vmatprep.subr.bf16.mxu1 %v1654_v17  ;;  %v648_v37 = vld [vmem:[#allocation8 + $0x58] sm:$0xff]  ;;  %v1642_v38 = vpack.c.bf16 %v550_v34, %v549_v33  ;;  %v551_v39 = vld [vmem:[#allocation6 + $0x70] sm:$0xff]  ;;  %v649_v42 = vld [vmem:[#allocation8 + $0x60] sm:$0xff] }
  0xc8   : > { %v552_v40 = vld [vmem:[#allocation6 + $0x78] sm:$0xff]  ;;  %v1670_v41 = vpack.c.bf16 %v648_v37, %v647_v36  ;;  %v650_v43 = vld [vmem:[#allocation8 + $0x68] sm:$0xff]  ;;  %v651_v47 = vld [vmem:[#allocation8 + $0x70] sm:$0xff] }
  0xc9   : > { %v1646_v44 = vpack.c.bf16 %v552_v40, %v551_v39  ;;  %v1674_v45 = vpack.c.bf16 %v650_v43, %v649_v42  ;;  %v536_v46 = vld [vmem:[%s2508_s19 + $0x8] sm:$0xff]  ;;  %v735_v50 = vld [vmem:[#allocation9] sm:$0xff]  ;;  %v737_v52 = vld [vmem:[#allocation9 + $0x10] sm:$0xff]  ;;  %s2089_s19 = scalar_lea.vmem %s2557_s13, 256 }
  0xca   : > { %1629 = vmatpush3.bf16.msra.mxu0 %v1626_v8  ;;  %1657 = vmatpush3.bf16.msra.mxu1 %v1654_v17  ;;  %v652_v48 = vld [vmem:[#allocation8 + $0x78] sm:$0xff]  ;;  %v736_v51 = vld [vmem:[#allocation9 + $0x8] sm:$0xff]  ;;  %v739_v56 = vld [vmem:[#allocation9 + $0x20] sm:$0xff]  ;;  %p2090_p7 = scmp.ne.s32.totalorder %s2557_s13, %s2089_s19 }
  0xcb   : > { %1631 = vmatprep.subr.bf16.mxu0 %v1630_v20  ;;  %1659 = vmatprep.subr.bf16.mxu1 %v1658_v23  ;;  %v1678_v49 = vpack.c.bf16 %v652_v48, %v651_v47  ;;  %v1682_v53 = vpack.c.bf16 %v736_v51, %v735_v50  ;;  %v738_v54 = vld [vmem:[#allocation9 + $0x18] sm:$0xff]  ;;  %v740_v57 = vld [vmem:[#allocation9 + $0x28] sm:$0xff]  ;;  %v741_v59 = vld [vmem:[#allocation9 + $0x30] sm:$0xff] }
  0xcc   : > { %v1686_v55 = vpack.c.bf16 %v738_v54, %v737_v52  ;;  %v1690_v58 = vpack.c.bf16 %v740_v57, %v739_v56  ;;  %v742_v60 = vld [vmem:[#allocation9 + $0x38] sm:$0xff]  ;;  %v743_v62 = vld [vmem:[#allocation9 + $0x40] sm:$0xff]  ;;  %v744_v63 = vld [vmem:[#allocation9 + $0x48] sm:$0xff]  ;;  %p2091_p12 = pnand %p2090_p7, %p2651_p4 }
  0xcd   : > { %v1694_v61 = vpack.c.bf16 %v742_v60, %v741_v59  ;;  %v1698_v0 = vpack.c.bf16 %v744_v63, %v743_v62  ;;  %v745_v1 = vld [vmem:[#allocation9 + $0x50] sm:$0xff]  ;;  %v746_v2 = vld [vmem:[#allocation9 + $0x58] sm:$0xff]  ;;  %v747_v4 = vld [vmem:[#allocation9 + $0x60] sm:$0xff] }
  0xce   : > { %1633 = vmatpush3.bf16.msra.mxu0 %v1630_v20  ;;  %1661 = vmatpush3.bf16.msra.mxu1 %v1658_v23  ;;  %v1702_v3 = vpack.c.bf16 %v746_v2, %v745_v1  ;;  %v748_v5 = vld [vmem:[#allocation9 + $0x68] sm:$0xff]  ;;  %v1287_v7 = vld [vmem:[%s2608_s2] ss:$0 sm:$0xff]  ;;  %v749_v14 = vld [vmem:[#allocation9 + $0x70] sm:$0xff]  ;;  %p2092_p1 = pneg %p2091_p12 }
  0xcf   : > { %1635 = vmatprep.subr.bf16.mxu0 %v1634_v26  ;;  %1663 = vmatprep.subr.bf16.mxu1 %v1662_v29  ;;  %v1706_v6 = vpack.c.bf16 %v748_v5, %v747_v4  ;;  %v750_v15 = vld [vmem:[#allocation9 + $0x78] sm:$0xff]  ;;  %v1288_v17 = vld [vmem:[%s2610_s4] ss:$0 sm:$0xff]  ;;  %v934_v23 = vld [vmem:[#allocation11 + $0x8] sm:$0xff] }
  0xd0   : > { %v1710_v16 = vpack.c.bf16 %v750_v15, %v749_v14  ;;  %v933_v22 = vld [vmem:[#allocation11] sm:$0xff]  ;;  %v935_v24 = vld [vmem:[#allocation11 + $0x10] sm:$0xff]  ;;  %v948_v62 = vld [vmem:[#allocation11 + $0x78] sm:$0xff] }
  0xd1   : > { %v1746_v25 = vpack.c.bf16 %v934_v23, %v933_v22  ;;  %v937_v28 = vld [vmem:[#allocation11 + $0x20] sm:$0xff]  ;;  %v939_v31 = vld [vmem:[#allocation11 + $0x30] sm:$0xff]  ;;  %v1034_v1 = vld [vmem:[#allocation12 + $0x8] sm:$0xff] }
  0xd2   : > { %1637 = vmatpush3.bf16.msra.mxu0 %v1634_v26  ;;  %1665 = vmatpush3.bf16.msra.mxu1 %v1662_v29  ;;  %v936_v26 = vld [vmem:[#allocation11 + $0x18] sm:$0xff]  ;;  %v938_v29 = vld [vmem:[#allocation11 + $0x28] sm:$0xff]  ;;  %v941_v34 = vld [vmem:[#allocation11 + $0x40] sm:$0xff] }
  0xd3   : > { %1639 = vmatprep.subr.bf16.mxu0 %v1638_v32  ;;  %1667 = vmatprep.subr.bf16.mxu1 %v1666_v35  ;;  %v1750_v27 = vpack.c.bf16 %v936_v26, %v935_v24  ;;  %v1754_v30 = vpack.c.bf16 %v938_v29, %v937_v28  ;;  %v943_v37 = vld [vmem:[#allocation11 + $0x50] sm:$0xff]  ;;  %v945_v40 = vld [vmem:[#allocation11 + $0x60] sm:$0xff]  ;;  %v1038_v14 = vld [vmem:[#allocation12 + $0x28] sm:$0xff] }
  0xd4   : > { %v1289_v43 = vld [vmem:[%s2612_s6] ss:$0 sm:$0xff]  ;;  %v1043_v22 = vld [vmem:[#allocation12 + $0x50] sm:$0xff]  ;;  %v1044_v23 = vld [vmem:[#allocation12 + $0x58] sm:$0xff] }
  0xd5   : > { %v1290_v56 = vld [vmem:[%s2647_s14] ss:$0 sm:$0xff]  ;;  %v1798_v24 = vpack.c.bf16 %v1044_v23, %v1043_v22  ;;  %v1046_v26 = vld [vmem:[#allocation12 + $0x68] sm:$0xff]  ;;  %v1047_v28 = vld [vmem:[#allocation12 + $0x70] sm:$0xff] }
  0xd6   : > { %1641 = vmatpush3.bf16.msra.mxu0 %v1638_v32  ;;  %1669 = vmatpush3.bf16.msra.mxu1 %v1666_v35  ;;  %v940_v32 = vld [vmem:[#allocation11 + $0x38] sm:$0xff]  ;;  %v942_v35 = vld [vmem:[#allocation11 + $0x48] sm:$0xff] }
  0xd7   : > { %1643 = vmatprep.subr.bf16.mxu0 %v1642_v38  ;;  %1671 = vmatprep.subr.bf16.mxu1 %v1670_v41  ;;  %v1758_v33 = vpack.c.bf16 %v940_v32, %v939_v31  ;;  %v1762_v36 = vpack.c.bf16 %v942_v35, %v941_v34  ;;  %v1048_v29 = vld [vmem:[#allocation12 + $0x78] sm:$0xff]  ;;  %v1291_v31 = vld [vmem:[%s2648_s16] ss:$0 sm:$0xff]  ;;  %s2093_s16 = sshll.u32 %s2177_s15, 4  ;;  %s2094_s16 = int_to_ptr.vmem [resolvable:$false] %s2093_s16 }
  0xd8   : > { %s2095_s12 = scalar_lea.vmem %s2094_s16, 512  ;;  %p2096_p13 = scmp.lt.s32.totalorder %s2557_s13, %s2094_s16 }
  0xd9   : > { %p2097_p0 = scmp.lt.s32.totalorder %s2095_s12, %s2089_s19 }
  0xda   : > { %1645 = vmatpush3.bf16.msra.mxu0 %v1642_v38  ;;  %1673 = vmatpush3.bf16.msra.mxu1 %v1670_v41  ;;  %v944_v38 = vld [vmem:[#allocation11 + $0x58] sm:$0xff]  ;;  %v946_v41 = vld [vmem:[#allocation11 + $0x68] sm:$0xff] }
  0xdb   : > { %1647 = vmatprep.subr.bf16.mxu0 %v1646_v44  ;;  %1675 = vmatprep.subr.bf16.mxu1 %v1674_v45  ;;  %v1766_v39 = vpack.c.bf16 %v944_v38, %v943_v37  ;;  %v1770_v42 = vpack.c.bf16 %v946_v41, %v945_v40  ;;  %v1292_v38 = vld [vmem:[%s2649_s7] ss:$0 sm:$0xff]  ;;  %p2098_p2 = por %p2097_p0, %p2096_p13 }
  0xdd   : > { %p2099_p8 = pnand %p2098_p2, %p2092_p1 }
  0xde   : > { %1649 = vmatpush3.bf16.msra.mxu0 %v1646_v44  ;;  %1677 = vmatpush3.bf16.msra.mxu1 %v1674_v45 }
  0xdf   : > { %1679 = vmatprep.subr.bf16.mxu1 %v1678_v49  ;;  %1683 = vmatprep.subr.bf16.mxu0 %v1682_v53 }
  0xe1   : > { %1441 = vmatmul.mubr.f32.vlgmr.msra.gmra.mrb[0].mxu0 %v536_v46 }
  0xe2   : > { %1681 = vmatpush3.bf16.msra.mxu1 %v1678_v49  ;;  %1685 = vmatpush3.bf16.msra.mxu0 %v1682_v53 }
  0xe3   : > { %1715 = vmatprep.subr.bf16.mxu1 %v1682_v53  ;;  %1687 = vmatprep.subr.bf16.mxu0 %v1686_v55 }
  0xe6   : > { %1689 = vmatpush3.bf16.msra.mxu0 %v1686_v55 }
  0xe7   : > { %1691 = vmatprep.subr.bf16.mxu0 %v1690_v58 }
  0xea   : > { %1693 = vmatpush3.bf16.msra.mxu0 %v1690_v58 }
  0xeb   : > { %1695 = vmatprep.subr.bf16.mxu0 %v1694_v61 }
  0xee   : > { %1697 = vmatpush3.bf16.msra.mxu0 %v1694_v61 }
  0xef   : > { %1699 = vmatprep.subr.bf16.mxu0 %v1698_v0 }
  0xf2   : > { %1701 = vmatpush3.bf16.msra.mxu0 %v1698_v0 }
  0xf3   : > { %1703 = vmatprep.subr.bf16.mxu0 %v1702_v3 }
  0xf6   : > { %1705 = vmatpush3.bf16.msra.mxu0 %v1702_v3 }
  0xf7   : > { %1707 = vmatprep.subr.bf16.mxu0 %v1706_v6 }
  0xfa   : > { %1709 = vmatpush3.bf16.msra.mxu0 %v1706_v6 }
  0xfb   : > { %1711 = vmatprep.subr.bf16.mxu0 %v1710_v16 }
  0xfe   : > { %1713 = vmatpush3.bf16.msra.mxu0 %v1710_v16 }
  0xff   : > { %1747 = vmatprep.subr.bf16.mxu0 %v1746_v25 }
 0x1b4   : > { %v1442_v8 = vpop.f32.mrb[0].mxu0 }
 0x1b5   : > { %v632_v9 = vadd.f32 %v1442_v8, %v1287_v7  ;;  %v626_v10 = vpop.f32.mrb[1].mxu0  ;;  %v1036_v8 = vld [vmem:[#allocation12 + $0x18] sm:$0xff] }
 0x1b6   : > { %v627_v11 = vadd.f32 %v1287_v7, %v626_v10  ;;  %v1035_v7 = vld [vmem:[#allocation12 + $0x10] sm:$0xff] }
 0x1b7   : > { %v636_v13 = vmax.f32 %v632_v9, 0.0 }
 0x1b8   : > { %v635_v12 = vmax.f32 %v627_v11, 0.0 }
 0x1ba   : > { %1475 = vmatprep.mubr.f32.mxu1 %v635_v12  ;;  %v1782_v12 = vpack.c.bf16 %v1036_v8, %v1035_v7 }
 0x1bb   : > { %1476 = vmatmul.mubr.f32.vlgmr.msra.gmra.mrb[0].mxu1 %v636_v13  ;;  %v1037_v13 = vld [vmem:[#allocation12 + $0x20] sm:$0xff] }
 0x1bc   : > { %1717 = vmatpush3.bf16.xpose.msra.mxu1 %v1682_v53  ;;  %v1786_v15 = vpack.c.bf16 %v1038_v14, %v1037_v13 }
 0x1bd   : > { %1719 = vmatprep.subr.bf16.mxu1 %v1686_v55 }
 0x1c4   : > { %1721 = vmatpush3.bf16.xpose.msra.mxu1 %v1686_v55 }
 0x1c5   : > { %1723 = vmatprep.subr.bf16.mxu1 %v1690_v58 }
 0x1cc   : > { %1725 = vmatpush3.bf16.xpose.msra.mxu1 %v1690_v58 }
 0x1cd   : > { %1727 = vmatprep.subr.bf16.mxu1 %v1694_v61 }
 0x1d4   : > { %1729 = vmatpush3.bf16.xpose.msra.mxu1 %v1694_v61  ;;  %v947_v61 = vld [vmem:[#allocation11 + $0x70] sm:$0xff] }
 0x1d5   : > { %1731 = vmatprep.subr.bf16.mxu1 %v1698_v0  ;;  %v1774_v63 = vpack.c.bf16 %v948_v62, %v947_v61 }
 0x1dc   : > { %1733 = vmatpush3.bf16.xpose.msra.mxu1 %v1698_v0  ;;  %v1033_v0 = vld [vmem:[#allocation12] sm:$0xff] }
 0x1dd   : > { %1735 = vmatprep.subr.bf16.mxu1 %v1702_v3  ;;  %v1778_v2 = vpack.c.bf16 %v1034_v1, %v1033_v0 }
 0x1e4   : > { %1737 = vmatpush3.bf16.xpose.msra.mxu1 %v1702_v3  ;;  %v928_v3 = vstv %s927_s23  ;;  %s2650_s23 = sld [smem:[#allocation24_spill]] }
 0x1e5   : > { %1739 = vmatprep.subr.bf16.mxu1 %v1706_v6 }
 0x1ea   : > { %s2562_s26 = scalar_lea.hbm %s2650_s23, %s1299_s20 }
 0x1ec   : > { %1741 = vmatpush3.bf16.xpose.msra.mxu1 %v1706_v6 }
 0x1ed   : > { %1743 = vmatprep.subr.bf16.mxu1 %v1710_v16 }
 0x1f4   : > { %1745 = vmatpush3.bf16.xpose.msra.mxu1 %v1710_v16  ;;  %v1039_v16 = vld [vmem:[#allocation12 + $0x30] sm:$0xff] }
 0x28e   : > { %v1477_v18 = vpop.f32.mrb[0].mxu1 }
 0x28f   : > { %v726_v19 = vpop.f32.mrb[1].mxu1  ;;  %v2536_v21 = vadd.f32 %v1477_v18, %v1288_v17 }
 0x290   : > { %v2534_v20 = vadd.f32 %v1288_v17, %v726_v19  ;;  %v1040_v17 = vld [vmem:[#allocation12 + $0x38] sm:$0xff]  ;;  %v1041_v19 = vld [vmem:[#allocation12 + $0x40] sm:$0xff] }
 0x291   : > { %v930_v4 = vmul.f32 %v928_v3, %v2536_v21  ;;  %v1790_v18 = vpack.c.bf16 %v1040_v17, %v1039_v16 }
 0x292   : > { %1510 = vmatprep.mubr.f32.mxu0 %v2534_v20  ;;  %v929_v6 = vmul.f32 %v928_v3, %v2534_v20  ;;  %v1042_v20 = vld [vmem:[#allocation12 + $0x48] sm:$0xff] }
 0x293   : > { %1511 = vmatmul.mubr.f32.vlgmr.msra.gmra.mrb[2].mxu0 %v2536_v21  ;;  %v1794_v21 = vpack.c.bf16 %v1042_v20, %v1041_v19 }
 0x294   : > { %1749 = vmatpush3.bf16.msra.mxu0 %v1746_v25  ;;  %v1045_v25 = vld [vmem:[#allocation12 + $0x60] sm:$0xff] }
 0x295   : > { %1751 = vmatprep.subr.bf16.mxu0 %v1750_v27 }
 0x298   : > { %1753 = vmatpush3.bf16.msra.mxu0 %v1750_v27  ;;  %v1802_v27 = vpack.c.bf16 %v1046_v26, %v1045_v25 }
 0x299   : > { %1755 = vmatprep.subr.bf16.mxu0 %v1754_v30 }
 0x29c   : > { %1757 = vmatpush3.bf16.msra.mxu0 %v1754_v30  ;;  %v1806_v30 = vpack.c.bf16 %v1048_v29, %v1047_v28 }
 0x29d   : > { %1759 = vmatprep.subr.bf16.mxu0 %v1758_v33 }
 0x2a0   : > { %1761 = vmatpush3.bf16.msra.mxu0 %v1758_v33 }
 0x2a1   : > { %1763 = vmatprep.subr.bf16.mxu0 %v1762_v36 }
 0x2a4   : > { %1765 = vmatpush3.bf16.msra.mxu0 %v1762_v36 }
 0x2a5   : > { %1767 = vmatprep.subr.bf16.mxu0 %v1766_v39 }
 0x2a8   : > { %1769 = vmatpush3.bf16.msra.mxu0 %v1766_v39 }
 0x2a9   : > { %1771 = vmatprep.subr.bf16.mxu0 %v1770_v42 }
 0x2ac   : > { %1773 = vmatpush3.bf16.msra.mxu0 %v1770_v42 }
 0x2ad   : > { %1775 = vmatprep.subr.bf16.mxu0 %v1774_v63 }
 0x2b0   : > { %1777 = vmatpush3.bf16.msra.mxu0 %v1774_v63 }
 0x2b1   : > { %1779 = vmatprep.subr.bf16.mxu0 %v1778_v2 }
 0x366   : > { %v1512_v44 = vpop.f32.mrb[2].mxu0 }
 0x367   : > { %v830_v45 = vadd.f32 %v1512_v44, %v1289_v43  ;;  %v824_v46 = vpop.f32.mrb[3].mxu0 }
 0x368   : > { %v825_v47 = vadd.f32 %v1289_v43, %v824_v46 }
 0x369   : > { %v834_v48 = vsub.f32 0.0, %v830_v45 }
 0x36a   : > { %v833_v49 = vsub.f32 0.0, %v825_v47 }
 0x36b   : > { %v837_v50 = vmul.f32 1.442695, %v834_v48 }
 0x36c   : > { %v835_v51 = vmul.f32 1.442695, %v833_v49 }
 0x36d   : > { %1911 = vpow2.f32 %v837_v50 }
 0x36e   : > { %1913 = vpow2.f32 %v835_v51 }
 0x377   : > { %v1912_v52 = vpop.eup %1911 }
 0x378   : > { %v1914_v53 = vpop.eup %1913  ;;  %v840_v54 = vadd.f32 1.0, %v1912_v52 }
 0x379   : > { %v839_v55 = vadd.f32 1.0, %v1914_v53 }
 0x37a   : > { %1915 = vrcp.f32 %v840_v54 }
 0x37b   : > { %1917 = vrcp.f32 %v839_v55 }
 0x384   : > { %v1916_v57 = vpop.eup %1915 }
 0x385   : > { %v1918_v58 = vpop.eup %1917  ;;  %v851_v60 = vmul.f32 %v1916_v57, %v1290_v56 }
 0x386   : > { %v850_v59 = vmul.f32 %v1918_v58, %v1290_v56 }
 0x388   : > { %1545 = vmatprep.mubr.f32.mxu1 %v850_v59 }
 0x389   : > { %1546 = vmatmul.mubr.f32.vlgmr.msra.gmra.mrb[2].mxu1 %v851_v60 }
 0x45c   : > { %v1547_v5 = vpop.f32.mrb[2].mxu1 }
 0x45d   : > { %v932_v9 = vadd.f32 %v1547_v5, %v930_v4  ;;  %v918_v10 = vpop.f32.mrb[3].mxu1 }
 0x45e   : > { %v931_v11 = vadd.f32 %v929_v6, %v918_v10 }
 0x460   : > { %1580 = vmatprep.mubr.f32.mxu0 %v931_v11 }
 0x461   : > { %1581 = vmatmul.mubr.f32.vlgmr.msra.gmra.mrb[4].mxu0 %v932_v9 }
 0x462   : > { %1781 = vmatpush3.bf16.msra.mxu0 %v1778_v2 }
 0x463   : > { %1783 = vmatprep.subr.bf16.mxu0 %v1782_v12 }
 0x466   : > { %1785 = vmatpush3.bf16.msra.mxu0 %v1782_v12 }
 0x467   : > { %1787 = vmatprep.subr.bf16.mxu0 %v1786_v15 }
 0x46a   : > { %1789 = vmatpush3.bf16.msra.mxu0 %v1786_v15 }
 0x46b   : > { %1791 = vmatprep.subr.bf16.mxu0 %v1790_v18 }
 0x46e   : > { %1793 = vmatpush3.bf16.msra.mxu0 %v1790_v18 }
 0x46f   : > { %1795 = vmatprep.subr.bf16.mxu0 %v1794_v21 }
 0x472   : > { %1797 = vmatpush3.bf16.msra.mxu0 %v1794_v21 }
 0x473   : > { %1799 = vmatprep.subr.bf16.mxu0 %v1798_v24 }
 0x476   : > { %1801 = vmatpush3.bf16.msra.mxu0 %v1798_v24 }
 0x477   : > { %1803 = vmatprep.subr.bf16.mxu0 %v1802_v27 }
 0x47a   : > { %1805 = vmatpush3.bf16.msra.mxu0 %v1802_v27 }
 0x47b   : > { %1807 = vmatprep.subr.bf16.mxu0 %v1806_v30 }
 0x47e   : > { %1809 = vmatpush3.bf16.msra.mxu0 %v1806_v30 }
 0x534   : > { %v1582_v32 = vpop.f32.mrb[4].mxu0 }
 0x535   : > { %v1028_v33 = vadd.f32 %v1582_v32, %v1291_v31  ;;  %v1022_v34 = vpop.f32.mrb[5].mxu0 }
 0x536   : > { %v1023_v35 = vadd.f32 %v1291_v31, %v1022_v34 }
 0x537   : > { %v1032_v37 = vmax.f32 %v1028_v33, 0.0 }
 0x538   : > { %v1031_v36 = vmax.f32 %v1023_v35, 0.0 }
 0x53a   : > { %1615 = vmatprep.mubr.f32.mxu0 %v1031_v36 }
 0x53b   : > { %1616 = vmatmul.mubr.f32.vlgmr.msra.gmra.mrb[6].mxu0 %v1032_v37 }
 0x60e   : > { %v1617_v39 = vpop.f32.mrb[6].mxu0 }
 0x60f   : > { %v1128_v40 = vadd.f32 %v1617_v39, %v1292_v38  ;;  %v1122_v41 = vpop.f32.mrb[7].mxu0 }
 0x610   : > { %v1123_v42 = vadd.f32 %v1292_v38, %v1122_v41 }
 0x611   : > { %1132 = vst [vmem:[%s532_s24 + $0x8] sm:$0xff] %v1128_v40 }
 0x612   : > { %1131 = vst [vmem:[%s532_s24] sm:$0xff] %v1123_v42 }
 0x613   : > { %2102 = shalt.err (!%p2099_p8)
}
 0x614   : > { %s2103_s24 = scalar_lea.hbm %s2562_s26, 256  ;;  %s2107_s20 = scalar_lea.hbm %s2650_s23, 512 }
 0x615   : > { %p2104_p6 = scmp.ne.s32.totalorder %s2562_s26, %s2103_s24  ;;  %p2108_p3 = scmp.lt.u32.totalorder %s2562_s26, %s2650_s23 }
 0x616   : > { %p2109_p5 = scmp.lt.u32.totalorder %s2107_s20, %s2103_s24  ;;  %p2111_p7 = scmp.lt.u32.totalorder %s2103_s24, %s2562_s26 }
 0x617   : > { %p2105_p10 = pnand %p2104_p6, %p2651_p4 }
 0x618   : > { %p2110_p9 = por %p2109_p5, %p2108_p3 }
 0x619   : > { %p2106_p11 = pneg %p2105_p10 }
 0x61a   : > { %p2112_p12 = por %p2111_p7, %p2110_p9 }
 0x61c   : > { %p2113_p1 = pnand %p2112_p12, %p2106_p11 }
 0x61e   : > { %2116 = shalt.err (!%p2113_p1)
}
 0x61f   : > { %s2178_s19 = smov 128   ;;  %s2179_s15 = smov 8  }
 0x620   : > { %1832 = dma.vmem_to_hbm [thread:$0]  (%p2651_p4), %s2557_s13, 256, %s2562_s26, %s1134_s21, %s2178_s19, %s2178_s19, %s2179_s15  }
 0x621 PF: > { %s1162_s16 = sand.u32 1, %s2155_s27   ;;  %p2652_p13 = scmp.ne.s32.totalorder %s2637_s17, 0 }
 0x622   : > { %p2653_p0 = scmp.ge.s32.totalorder %s2167_s30, 2  ;;  %s1163_s12 = scalar_lea.sflag [#allocation5], %s1162_s16 }
 0x624   : > { %p1855_p2 = pnand %p2653_p0, %p2652_p13 }
 0x626   : > { %2150 = dma.done.wait (!%p1855_p2), %s1163_s12, 256  }
 0x627   : > { %2152 = vsyncadd (!%p1855_p2), %s1163_s12, 4294967040  ;;  %p30_p8 = scmp.ge.s32.totalorder %s2426_s8, 4   ;;  %s2654_s27 = smov %s2159_s28 }
 0x628   : > { %s2655_s28 = smov %s2163_s29  ;;  %s2656_s29 = smov %s2438_s10 }
 0x629   : > { %s2657_s30 = smov %s2426_s8  ;;  %32 = sbr.rel (!%p30_p8) target bundleno = 15 (0xf), region = 137 }
 0x630   :  { %1168 = vsyncpa [#allocation4], 1 }
 0x631   :  { %1170 = vsyncpa [#allocation4 + $0x1], 1 }
 0x632   :  { %1171 = vsyncpa [#allocation7], 1 }
 0x633   :  { %1172 = vsyncpa [#allocation10], 1 }
 0x634   :  { %1173 = vsyncpa [#allocation13], 1 }
 0x635   :  { %1174 = vsyncpa [#allocation5], 1 }
 0x636   :  { %1176 = vsyncpa [#allocation5 + $0x1], 1 }

// kernel: tpu_custom_call.1
= control target key start
LH: loop header
LB: loop body
LE: loop exit
PB: predicated region body
PF: predicated region fallthrough
CT: control target
= control target key end

     0   :  { %s2606_s0 = inlined_call_operand.hbm [shape: f32[32,128], index: 0, kind: input, shape index: {}]   ;;  %s2607_s1 = inlined_call_operand.hbm [shape: f32[128,128], index: 1, kind: input, shape index: {}]   ;;  %s2608_s2 = inlined_call_operand.vmem [shape: f32[1,128], index: 2, kind: input, shape index: {}]   ;;  %s2609_s3 = inlined_call_operand.hbm [shape: f32[128,128], index: 3, kind: input, shape index: {}]   ;;  %s2610_s4 = inlined_call_operand.vmem [shape: f32[1,128], index: 4, kind: input, shape index: {}]   ;;  %s2611_s5 = inlined_call_operand.hbm [shape: f32[128,128], index: 5, kind: input, shape index: {}]   ;;  %s2612_s6 = inlined_call_operand.vmem [shape: f32[1,128], index: 6, kind: input, shape index: {}]   ;;  %s2613_s7 = inlined_call_operand.vmem [shape: f32[1,128], index: 7, kind: input, shape index: {}]   ;;  %s2614_s8 = inlined_call_operand.<no memory space> [shape: f32[1,1], index: 8, kind: input, shape index: {}]   ;;  %s2615_s9 = inlined_call_operand.hbm [shape: f32[128,128], index: 9, kind: input, shape index: {}]   ;;  %s2616_s10 = inlined_call_operand.vmem [shape: f32[1,128], index: 10, kind: input, shape index: {}]   ;;  %s2617_s11 = inlined_call_operand.hbm [shape: f32[128,128], index: 11, kind: input, shape index: {}]   ;;  %s2618_s12 = inlined_call_operand.vmem [shape: f32[1,128], index: 12, kind: input, shape index: {}]   ;;  %s2619_s13 = inlined_call_operand.hbm [shape: f32[32,128], index: 13, kind: output, shape index: {}]  }
   0x1   :  { %2625 = sst [smem:[#allocation20_spill]] %s2607_s1 }
   0x2   :  { %2626 = sst [smem:[#allocation21_spill]] %s2613_s7 }
   0x3   :  { %2627 = sst [smem:[#allocation22_spill]] %s2616_s10 }
   0x4   :  { %2628 = sst [smem:[#allocation23_spill]] %s2618_s12 }
   0x5   :  { %2629 = sst [smem:[#allocation24_spill]] %s2619_s13 }
   0x6   :  { %18 = sst [smem:[#allocation2]] %s2614_s8 }
   0x7   :  { %19 = vsyncpa [#allocation4], 0 }
   0x8   :  { %21 = vsyncpa [#allocation4 + $0x1], 0 }
   0x9   :  { %22 = vsyncpa [#allocation7], 0 }
   0xa   :  { %23 = vsyncpa [#allocation10], 0 }
   0xb   :  { %24 = vsyncpa [#allocation13], 0 }
   0xc   :  { %25 = vsyncpa [#allocation5], 0 }
   0xd   :  { %27 = vsyncpa [#allocation5 + $0x1], 0  ;;  %s2253_s27 = smov 0   ;;  %s2255_s28 = smov 0  }
   0xe   :  { %s2257_s29 = smov 0   ;;  %s2259_s30 = smov 0  }
   0xf LB: > { %s2169_s8 = smov [#allocation6]   ;;  %s2274_s15 = sadd.s32 4294967295, %s2167_s30   ;;  %s2167_s30 = sphi %s2259_s30, %s2657_s30   ;;  %s2163_s29 = sphi %s2257_s29, %s2656_s29   ;;  %s2159_s28 = sphi %s2255_s28, %s2655_s28   ;;  %s2155_s27 = sphi %s2253_s27, %s2654_s27  }
  0x10   : > { %s354_s14 = sshll.u32 %s2169_s8, 4  ;;  %p1269_p0 = scmp.ge.s32.totalorder %s2167_s30, 1  ;;  %s2279_s14 = int_to_ptr.vmem [resolvable:$true] %s354_s14 }
  0x11   : > { %p2621_p1 = scmp.eq.s32.totalorder %s2274_s15, 0  ;;  %p342_p2 = scmp.lt.s32.totalorder %s2167_s30, 3 }
  0x12   : > { %s2170_s17 = smov [#allocation9]   ;;  %s2171_s20 = smov [#allocation8]  }
  0x13   : > { %p2281_p3 = pnand %p1269_p0, %p342_p2  ;;  %s386_s18 = sshll.u32 %s2170_s17, 4  ;;  %s2294_s18 = int_to_ptr.vmem [resolvable:$true] %s386_s18 }
  0x14   : > { %s370_s21 = sshll.u32 %s2171_s20, 4  ;;  %s2632_s1 = sld [smem:[#allocation20_spill]]  ;;  %s2296_s21 = int_to_ptr.vmem [resolvable:$true] %s370_s21 }
  0x15   : > { %s2630_s16 = scalar_select %p2281_p3, 1, 0 }
  0x16   : > { %p1834_p5 = pneg %p2281_p3 }
  0x18   : > { %p2290_p6 = pnand %p1834_p5, %p2621_p1 }
  0x1a   : > { %s1919_s24 = scalar_lea.hbm %s2632_s1, 2048  ;;  %p2306_p8 = pneg %p2290_p6 }
  0x1b   : > { %p1920_p7 = scmp.ne.s32.totalorder %s2632_s1, %s1919_s24  ;;  %p1926_p11 = scmp.lt.u32.totalorder %s1919_s24, %s2632_s1 }
  0x1d   : > { %p1922_p9 = pnand %p2306_p8, %p1920_p7 }
  0x1f   : > { %p1923_p10 = pneg %p1922_p9 }
  0x21   : > { %p1928_p12 = pnand %p1926_p11, %p1923_p10 }
  0x23   : > { %1931 = shalt.err (!%p1928_p12)
}
  0x24   : > { %s1932_s22 = scalar_lea.vmem %s2279_s14, 2048  ;;  %p1940_p5 = scmp.lt.s32.totalorder %s2279_s14, %s2279_s14 }
  0x25   : > { %p1933_p13 = scmp.ne.s32.totalorder %s2279_s14, %s1932_s22  ;;  %p1941_p4 = scmp.lt.s32.totalorder %s1932_s22, %s1932_s22 }
  0x27   : > { %p1935_p0 = pnand %p1933_p13, %p2306_p8  ;;  %p1942_p7 = por %p1941_p4, %p1940_p5 }
  0x29   : > { %p1936_p2 = pneg %p1935_p0 }
  0x2b   : > { %p1943_p9 = pnand %p1942_p7, %p1936_p2 }
  0x2d   : > { %1946 = shalt.err (!%p1943_p9)
}
  0x2e   : > { %s2623_s23 = smov 128   ;;  %s2173_s24 = smov 8  }
  0x2f   : > { %1837 = dma.hbm_to_vmem [thread:$0]  (!%p2290_p6), %s2632_s1, 2048, %s2279_s14, [#allocation7], %s2623_s23, %s2623_s23, %s2173_s24  }
  0x30   : > { %s1947_s22 = scalar_lea.hbm %s2611_s5, 2048 }
  0x31   : > { %p1948_p4 = scmp.ne.s32.totalorder %s2611_s5, %s1947_s22  ;;  %p1954_p12 = scmp.lt.u32.totalorder %s1947_s22, %s2611_s5 }
  0x33   : > { %p1950_p10 = pnand %p1948_p4, %p2306_p8 }
  0x35   : > { %p1951_p11 = pneg %p1950_p10 }
  0x37   : > { %p1956_p13 = pnand %p1954_p12, %p1951_p11 }
  0x39   : > { %1959 = shalt.err (!%p1956_p13)
}
  0x3a   : > { %s1960_s14 = scalar_lea.vmem %s2294_s18, 2048  ;;  %p1968_p7 = scmp.lt.s32.totalorder %s2294_s18, %s2294_s18 }
  0x3b   : > { %p1961_p0 = scmp.ne.s32.totalorder %s2294_s18, %s1960_s14  ;;  %p1969_p9 = scmp.lt.s32.totalorder %s1960_s14, %s1960_s14 }
  0x3d   : > { %p1963_p2 = pnand %p1961_p0, %p2306_p8  ;;  %p1970_p4 = por %p1969_p9, %p1968_p7 }
  0x3f   : > { %p1964_p5 = pneg %p1963_p2 }
  0x41   : > { %p1971_p10 = pnand %p1970_p4, %p1964_p5 }
  0x43   : > { %1974 = shalt.err (!%p1971_p10)
}
  0x44   : > { %1843 = dma.hbm_to_vmem [thread:$0]  (!%p2290_p6), %s2611_s5, 2048, %s2294_s18, [#allocation10], %s2623_s23, %s2623_s23, %s2173_s24  }
  0x45   : > { %s1975_s25 = scalar_lea.hbm %s2609_s3, 2048 }
  0x46   : > { %p1976_p11 = scmp.ne.s32.totalorder %s2609_s3, %s1975_s25  ;;  %p1982_p0 = scmp.lt.u32.totalorder %s1975_s25, %s2609_s3 }
  0x48   : > { %p1978_p12 = pnand %p1976_p11, %p2306_p8 }
  0x4a   : > { %p1979_p13 = pneg %p1978_p12 }
  0x4c   : > { %p1984_p2 = pnand %p1982_p0, %p1979_p13 }
  0x4e   : > { %1987 = shalt.err (!%p1984_p2)
}
  0x4f   : > { %s1988_s18 = scalar_lea.vmem %s2296_s21, 2048  ;;  %p1996_p4 = scmp.lt.s32.totalorder %s2296_s21, %s2296_s21 }
  0x50   : > { %p1989_p5 = scmp.ne.s32.totalorder %s2296_s21, %s1988_s18  ;;  %p1997_p10 = scmp.lt.s32.totalorder %s1988_s18, %s1988_s18 }
  0x52   : > { %p1991_p7 = pnand %p1989_p5, %p2306_p8  ;;  %p1998_p11 = por %p1997_p10, %p1996_p4 }
  0x54   : > { %p1992_p9 = pneg %p1991_p7 }
  0x56   : > { %p1999_p12 = pnand %p1998_p11, %p1992_p9 }
  0x58   : > { %2002 = shalt.err (!%p1999_p12)
}
  0x59   : > { %1840 = dma.hbm_to_vmem [thread:$0]  (!%p2290_p6), %s2609_s3, 2048, %s2296_s21, [#allocation7], %s2623_s23, %s2623_s23, %s2173_s24  }
  0x5a   : > { %s2174_s10 = smov [#allocation11]   ;;  %s2175_s13 = smov [#allocation12]  }
  0x5b   : > { %s408_s12 = sshll.u32 %s2174_s10, 4  ;;  %s424_s25 = sshll.u32 %s2175_s13, 4  ;;  %s409_s12 = int_to_ptr.vmem [resolvable:$true] %s408_s12  ;;  %s425_s25 = int_to_ptr.vmem [resolvable:$true] %s424_s25 }
  0x5c   : > { %s2003_s20 = scalar_lea.hbm %s2615_s9, 2048 }
  0x5d   : > { %p2004_p13 = scmp.ne.s32.totalorder %s2615_s9, %s2003_s20  ;;  %p2010_p5 = scmp.lt.u32.totalorder %s2003_s20, %s2615_s9 }
  0x5f   : > { %p2006_p0 = pnand %p2004_p13, %p2306_p8 }
  0x61   : > { %p2007_p2 = pneg %p2006_p0 }
  0x63   : > { %p2012_p7 = pnand %p2010_p5, %p2007_p2 }
  0x65   : > { %2015 = shalt.err (!%p2012_p7)
}
  0x66   : > { %s2016_s21 = scalar_lea.vmem %s409_s12, 2048  ;;  %p2024_p11 = scmp.lt.s32.totalorder %s409_s12, %s409_s12 }
  0x67   : > { %p2017_p9 = scmp.ne.s32.totalorder %s409_s12, %s2016_s21  ;;  %p2025_p12 = scmp.lt.s32.totalorder %s2016_s21, %s2016_s21 }
  0x69   : > { %p2019_p4 = pnand %p2017_p9, %p2306_p8  ;;  %p2026_p1 = por %p2025_p12, %p2024_p11 }
  0x6b   : > { %p2020_p10 = pneg %p2019_p4 }
  0x6d   : > { %p2027_p3 = pnand %p2026_p1, %p2020_p10 }
  0x6f   : > { %2030 = shalt.err (!%p2027_p3)
}
  0x70   : > { %1846 = dma.hbm_to_vmem [thread:$0]  (!%p2290_p6), %s2615_s9, 2048, %s409_s12, [#allocation10], %s2623_s23, %s2623_s23, %s2173_s24  }
  0x71   : > { %s2031_s26 = scalar_lea.hbm %s2617_s11, 2048 }
  0x72   : > { %p2032_p1 = scmp.ne.s32.totalorder %s2617_s11, %s2031_s26  ;;  %p2038_p0 = scmp.lt.u32.totalorder %s2031_s26, %s2617_s11 }
  0x74   : > { %p2034_p3 = pnand %p2032_p1, %p2306_p8 }
  0x76   : > { %p2035_p13 = pneg %p2034_p3 }
  0x78   : > { %p2040_p2 = pnand %p2038_p0, %p2035_p13 }
  0x7a   : > { %2043 = shalt.err (!%p2040_p2)
}
  0x7b   : > { %s2044_s14 = scalar_lea.vmem %s425_s25, 2048  ;;  %p2052_p4 = scmp.lt.s32.totalorder %s425_s25, %s425_s25 }
  0x7c   : > { %p2045_p5 = scmp.ne.s32.totalorder %s425_s25, %s2044_s14  ;;  %p2053_p10 = scmp.lt.s32.totalorder %s2044_s14, %s2044_s14 }
  0x7e   : > { %p2047_p7 = pnand %p2045_p5, %p2306_p8  ;;  %p2054_p11 = por %p2053_p10, %p2052_p4 }
  0x80   : > { %p2048_p9 = pneg %p2047_p7 }
  0x82   : > { %p2055_p12 = pnand %p2054_p11, %p2048_p9 }
  0x84   : > { %2058 = shalt.err (!%p2055_p12)
}
  0x85   : > { %1849 = dma.hbm_to_vmem [thread:$0]  (!%p2290_p6), %s2617_s11, 2048, %s425_s25, [#allocation13], %s2623_s23, %s2623_s23, %s2173_s24  }
  0x86   : > { %s1268_s19 = sadd.s32 4294967294, %s2167_s30   ;;  %s2426_s8 = sadd.s32 1, %s2167_s30  }
  0x87   : > { %s40_s1 = sadd.s32 1, %s2163_s29  ;;  %s37_s7 = ssub.s32 %s2167_s30, %s2426_s8 }
  0x88   : > { %p47_p8 = scmp.ne.s32.totalorder %s2163_s29, %s2159_s28  ;;  %p38_p1 = scmp.eq.s32.totalorder %s37_s7, 0 }
  0x89   : > { %p48_p3 = scmp.eq.s32.totalorder %s2167_s30, 0  ;;  %p53_p13 = scmp.ne.s32.totalorder %s2159_s28, %s2155_s27 }
  0x8a   : > { %p329_p0 = scmp.eq.s32.totalorder %s2274_s15, 1  ;;  %p2634_p5 = scmp.eq.s32.totalorder %s2274_s15, 0 }
  0x8b   : > { %s2438_s10 = scalar_select %p38_p1, %s2163_s29, %s40_s1  }
  0x8c   : > { %p49_p2 = por %p48_p3, %p47_p8  ;;  %p2442_p7 = por %p2634_p5, %p53_p13 }
  0x8d   : > { %p2446_p6 = por %p329_p0, %p47_p8  ;;  %p335_p9 = scmp.eq.s32.totalorder %s1268_s19, 1 }
  0x8e   : > { %p1863_p4 = scmp.lt.s32.totalorder %s2167_s30, 2  ;;  %s441_s26 = sand.u32 1, %s2163_s29  }
  0x8f   : > { %s2636_s25 = scalar_select %p2446_p6, 1, 0 }
  0x90   : > { %p2452_p10 = por %p335_p9, %p53_p13  ;;  %s1276_s20 = sshll.u32 %s441_s26, 4 }
  0x91   : > { %s1298_s22 = sshll.u32 %s2167_s30, 8  ;;  %s445_s21 = scalar_lea.vmem [#allocation3], %s1276_s20 }
  0x92   : > { %s2637_s17 = scalar_select %p2452_p10, 1, 0 }
  0x93   : > { %s2460_s12 = scalar_lea.hbm %s2606_s0, %s1298_s22  ;;  %s452_s1 = sshll.u32 %s445_s21, 4  ;;  %s2466_s1 = int_to_ptr.vmem [resolvable:$true] %s452_s1 }
  0x94   : > { %p2462_p11 = pnand %p1863_p4, %p49_p2  ;;  %s2468_s7 = scalar_lea.sflag [#allocation4], %s441_s26 }
  0x95   : > { %s2059_s23 = scalar_lea.hbm %s2460_s12, 256  ;;  %s2064_s18 = scalar_lea.hbm %s2606_s0, 512 }
  0x96   : > { %p2060_p12 = scmp.ne.s32.totalorder %s2460_s12, %s2059_s23  ;;  %p2061_p8 = pneg %p2462_p11 }
  0x97   : > { %p2065_p13 = scmp.lt.u32.totalorder %s2460_s12, %s2606_s0  ;;  %p2066_p0 = scmp.lt.u32.totalorder %s2064_s18, %s2059_s23 }
  0x98   : > { %p2062_p1 = pnand %p2061_p8, %p2060_p12  ;;  %p2068_p5 = scmp.lt.u32.totalorder %s2059_s23, %s2460_s12 }
  0x99   : > { %p2067_p2 = por %p2066_p0, %p2065_p13 }
  0x9a   : > { %p2063_p3 = pneg %p2062_p1 }
  0x9b   : > { %p2069_p9 = por %p2068_p5, %p2067_p2 }
  0x9d   : > { %p2070_p4 = pnand %p2069_p9, %p2063_p3 }
  0x9f   : > { %2073 = shalt.err (!%p2070_p4)
}
  0xa0   : > { %s2074_s26 = scalar_lea.vmem %s2466_s1, 256  ;;  %s2176_s20 = smov [#allocation3]  }
  0xa1   : > { %p2075_p12 = scmp.ne.s32.totalorder %s2466_s1, %s2074_s26  ;;  %s2079_s22 = sshll.u32 %s2176_s20, 4  ;;  %s2080_s22 = int_to_ptr.vmem [resolvable:$false] %s2079_s22 }
  0xa2   : > { %s2081_s14 = scalar_lea.vmem %s2080_s22, 512  ;;  %p2082_p6 = scmp.lt.s32.totalorder %s2466_s1, %s2080_s22 }
  0xa3   : > { %p2077_p1 = pnand %p2075_p12, %p2061_p8  ;;  %p2083_p13 = scmp.lt.s32.totalorder %s2081_s14, %s2074_s26 }
  0xa5   : > { %p2078_p10 = pneg %p2077_p1  ;;  %p2084_p0 = por %p2083_p13, %p2082_p6 }
  0xa7   : > { %p2085_p2 = pnand %p2084_p0, %p2078_p10 }
  0xa9   : > { %2088 = shalt.err (!%p2085_p2)
}
  0xaa   : > { %s2639_s23 = smov 128   ;;  %p2640_p8 = scmp.ne.s32.totalorder %s2630_s16, 0 }
  0xab   : > { %1853 = dma.hbm_to_vmem [thread:$0]  (!%p2462_p11), %s2460_s12, 256, %s2466_s1, %s2468_s7, %s2639_s23, %s2639_s23, %s2173_s24  }
  0xac   : > { %464 = sbr.rel (%p2640_p8) target bundleno = 1569 (0x621), region = 72  ;;  %s2502_s18 = sand.u32 (!%p2640_p8), 1, %s2159_s28  }
  0xad   : > { %s1280_s21 = sshll.u32 (!%p2640_p8), %s2502_s18, 4  ;;  %s467_s26 = scalar_lea.sflag (!%p2640_p8), [#allocation4], %s2502_s18 }
  0xae   : > { %s2508_s19 = scalar_lea.vmem (!%p2640_p8), [#allocation3], %s1280_s21 }
  0xb3   : > { %2134 = dma.done.wait (%p2442_p7), %s467_s26, 256  }
  0xb4   : > { %2136 = vsyncadd (%p2442_p7), %s467_s26, 4294967040  ;;  %p2641_p6 = scmp.eq.s32.totalorder %s2274_s15, 0 }
  0xb6   : > { %2138 = dma.done.wait (%p2641_p6), [#allocation7], 4096   ;;  %p2642_p10 = pmov %p2641_p6 }
  0xb7   : > { %p2643_p11 = pmov %p2641_p6 }
  0xb8   : > { %2140 = vsyncadd (%p2642_p10), [#allocation7], 4294963200 }
  0xb9   : > { %2142 = dma.done.wait (%p2643_p11), [#allocation10], 4096   ;;  %p2644_p3 = pmov %p2641_p6 }
  0xbb   : > { %2144 = vsyncadd (%p2644_p3), [#allocation10], 4294963200  ;;  %p2645_p5 = pmov %p2644_p3 }
  0xbc   : > { %p2646_p9 = pmov %p2644_p3 }
  0xbd   : > { %2146 = dma.done.wait (%p2645_p5), [#allocation13], 2048  }
  0xbe   : > { %2148 = vsyncadd (%p2646_p9), [#allocation13], 4294965248  ;;  %v537_v0 = vld [vmem:[#allocation6] sm:$0xff]  ;;  %v538_v1 = vld [vmem:[#allocation6 + $0x8] sm:$0xff]  ;;  %s2647_s14 = sld [smem:[#allocation21_spill]]  ;;  %s927_s23 = sld [smem:[#allocation2]] }
  0xbf   : > { %v539_v2 = vld [vmem:[#allocation6 + $0x10] sm:$0xff]  ;;  %v1618_v3 = vpack.c.bf16 %v538_v1, %v537_v0  ;;  %v540_v4 = vld [vmem:[#allocation6 + $0x18] sm:$0xff]  ;;  %v541_v6 = vld [vmem:[#allocation6 + $0x20] sm:$0xff]  ;;  %s2648_s16 = sld [smem:[#allocation22_spill]]  ;;  %s532_s24 = scalar_lea.vmem [#allocation14], %s1280_s21 }
  0xc0   : > { %v1622_v5 = vpack.c.bf16 %v540_v4, %v539_v2  ;;  %v542_v7 = vld [vmem:[#allocation6 + $0x28] sm:$0xff]  ;;  %v543_v9 = vld [vmem:[#allocation6 + $0x30] sm:$0xff]  ;;  %v544_v10 = vld [vmem:[#allocation6 + $0x38] sm:$0xff]  ;;  %s1147_s13 = sshll.u32 %s532_s24, 4  ;;  %s2649_s7 = sld [smem:[#allocation23_spill]]  ;;  %s2557_s13 = int_to_ptr.vmem [resolvable:$true] %s1147_s13 }
  0xc1   : > { %1619 = vmatprep.subr.bf16.mxu0 %v1618_v3  ;;  %v1626_v8 = vpack.c.bf16 %v542_v7, %v541_v6  ;;  %v535_v11 = vld [vmem:[%s2508_s19] sm:$0xff]  ;;  %v638_v13 = vld [vmem:[#allocation8 + $0x8] sm:$0xff]  ;;  %v640_v16 = vld [vmem:[#allocation8 + $0x18] sm:$0xff]  ;;  %v1630_v20 = vpack.c.bf16 %v544_v10, %v543_v9  ;;  %s1299_s20 = sshll.u32 %s2274_s15, 8  ;;  %s1134_s21 = scalar_lea.sflag [#allocation5], %s2502_s18 }
  0xc2   : > { %1621 = vmatpush3.bf16.msra.mxu0 %v1618_v3  ;;  %1440 = vmatprep.mubr.f32.mxu0 %v535_v11  ;;  %v637_v12 = vld [vmem:[#allocation8] sm:$0xff]  ;;  %v639_v14 = vld [vmem:[#allocation8 + $0x10] sm:$0xff]  ;;  %v642_v19 = vld [vmem:[#allocation8 + $0x28] sm:$0xff]  ;;  %p2651_p4 = scmp.ne.s32.totalorder %s2636_s25, 0  ;;  %s2177_s15 = smov [#allocation14]  }
  0xc3   : > { %1623 = vmatprep.subr.bf16.mxu0 %v1622_v5  ;;  %v1650_v15 = vpack.c.bf16 %v638_v13, %v637_v12  ;;  %v1654_v17 = vpack.c.bf16 %v640_v16, %v639_v14  ;;  %v641_v18 = vld [vmem:[#allocation8 + $0x20] sm:$0xff]  ;;  %v546_v22 = vld [vmem:[#allocation6 + $0x48] sm:$0xff]  ;;  %v643_v24 = vld [vmem:[#allocation8 + $0x30] sm:$0xff] }
  0xc4   : > { %v545_v21 = vld [vmem:[#allocation6 + $0x40] sm:$0xff]  ;;  %v1658_v23 = vpack.c.bf16 %v642_v19, %v641_v18  ;;  %v644_v25 = vld [vmem:[#allocation8 + $0x38] sm:$0xff]  ;;  %v547_v27 = vld [vmem:[#allocation6 + $0x50] sm:$0xff] }
  0xc5   : > { %1651 = vmatprep.subr.bf16.mxu1 %v1650_v15  ;;  %v1634_v26 = vpack.c.bf16 %v546_v22, %v545_v21  ;;  %v548_v28 = vld [vmem:[#allocation6 + $0x58] sm:$0xff]  ;;  %v1662_v29 = vpack.c.bf16 %v644_v25, %v643_v24  ;;  %v645_v30 = vld [vmem:[#allocation8 + $0x40] sm:$0xff]  ;;  %v646_v31 = vld [vmem:[#allocation8 + $0x48] sm:$0xff] }
  0xc6   : > { %1625 = vmatpush3.bf16.msra.mxu0 %v1622_v5  ;;  %1653 = vmatpush3.bf16.msra.mxu1 %v1650_v15  ;;  %v1638_v32 = vpack.c.bf16 %v548_v28, %v547_v27  ;;  %v549_v33 = vld [vmem:[#allocation6 + $0x60] sm:$0xff]  ;;  %v550_v34 = vld [vmem:[#allocation6 + $0x68] sm:$0xff]  ;;  %v1666_v35 = vpack.c.bf16 %v646_v31, %v645_v30  ;;  %v647_v36 = vld [vmem:[#allocation8 + $0x50] sm:$0xff] }
  0xc7   : > { %1627 = vmatprep.subr.bf16.mxu0 %v1626_v8  ;;  %1655 = vmatprep.subr.bf16.mxu1 %v1654_v17  ;;  %v648_v37 = vld [vmem:[#allocation8 + $0x58] sm:$0xff]  ;;  %v1642_v38 = vpack.c.bf16 %v550_v34, %v549_v33  ;;  %v551_v39 = vld [vmem:[#allocation6 + $0x70] sm:$0xff]  ;;  %v649_v42 = vld [vmem:[#allocation8 + $0x60] sm:$0xff] }
  0xc8   : > { %v552_v40 = vld [vmem:[#allocation6 + $0x78] sm:$0xff]  ;;  %v1670_v41 = vpack.c.bf16 %v648_v37, %v647_v36  ;;  %v650_v43 = vld [vmem:[#allocation8 + $0x68] sm:$0xff]  ;;  %v651_v47 = vld [vmem:[#allocation8 + $0x70] sm:$0xff] }
  0xc9   : > { %v1646_v44 = vpack.c.bf16 %v552_v40, %v551_v39  ;;  %v1674_v45 = vpack.c.bf16 %v650_v43, %v649_v42  ;;  %v536_v46 = vld [vmem:[%s2508_s19 + $0x8] sm:$0xff]  ;;  %v735_v50 = vld [vmem:[#allocation9] sm:$0xff]  ;;  %v737_v52 = vld [vmem:[#allocation9 + $0x10] sm:$0xff]  ;;  %s2089_s19 = scalar_lea.vmem %s2557_s13, 256 }
  0xca   : > { %1629 = vmatpush3.bf16.msra.mxu0 %v1626_v8  ;;  %1657 = vmatpush3.bf16.msra.mxu1 %v1654_v17  ;;  %v652_v48 = vld [vmem:[#allocation8 + $0x78] sm:$0xff]  ;;  %v736_v51 = vld [vmem:[#allocation9 + $0x8] sm:$0xff]  ;;  %v739_v56 = vld [vmem:[#allocation9 + $0x20] sm:$0xff]  ;;  %p2090_p7 = scmp.ne.s32.totalorder %s2557_s13, %s2089_s19 }
  0xcb   : > { %1631 = vmatprep.subr.bf16.mxu0 %v1630_v20  ;;  %1659 = vmatprep.subr.bf16.mxu1 %v1658_v23  ;;  %v1678_v49 = vpack.c.bf16 %v652_v48, %v651_v47  ;;  %v1682_v53 = vpack.c.bf16 %v736_v51, %v735_v50  ;;  %v738_v54 = vld [vmem:[#allocation9 + $0x18] sm:$0xff]  ;;  %v740_v57 = vld [vmem:[#allocation9 + $0x28] sm:$0xff]  ;;  %v741_v59 = vld [vmem:[#allocation9 + $0x30] sm:$0xff] }
  0xcc   : > { %v1686_v55 = vpack.c.bf16 %v738_v54, %v737_v52  ;;  %v1690_v58 = vpack.c.bf16 %v740_v57, %v739_v56  ;;  %v742_v60 = vld [vmem:[#allocation9 + $0x38] sm:$0xff]  ;;  %v743_v62 = vld [vmem:[#allocation9 + $0x40] sm:$0xff]  ;;  %v744_v63 = vld [vmem:[#allocation9 + $0x48] sm:$0xff]  ;;  %p2091_p12 = pnand %p2090_p7, %p2651_p4 }
  0xcd   : > { %v1694_v61 = vpack.c.bf16 %v742_v60, %v741_v59  ;;  %v1698_v0 = vpack.c.bf16 %v744_v63, %v743_v62  ;;  %v745_v1 = vld [vmem:[#allocation9 + $0x50] sm:$0xff]  ;;  %v746_v2 = vld [vmem:[#allocation9 + $0x58] sm:$0xff]  ;;  %v747_v4 = vld [vmem:[#allocation9 + $0x60] sm:$0xff] }
  0xce   : > { %1633 = vmatpush3.bf16.msra.mxu0 %v1630_v20  ;;  %1661 = vmatpush3.bf16.msra.mxu1 %v1658_v23  ;;  %v1702_v3 = vpack.c.bf16 %v746_v2, %v745_v1  ;;  %v748_v5 = vld [vmem:[#allocation9 + $0x68] sm:$0xff]  ;;  %v1287_v7 = vld [vmem:[%s2608_s2] ss:$0 sm:$0xff]  ;;  %v749_v14 = vld [vmem:[#allocation9 + $0x70] sm:$0xff]  ;;  %p2092_p1 = pneg %p2091_p12 }
  0xcf   : > { %1635 = vmatprep.subr.bf16.mxu0 %v1634_v26  ;;  %1663 = vmatprep.subr.bf16.mxu1 %v1662_v29  ;;  %v1706_v6 = vpack.c.bf16 %v748_v5, %v747_v4  ;;  %v750_v15 = vld [vmem:[#allocation9 + $0x78] sm:$0xff]  ;;  %v1288_v17 = vld [vmem:[%s2610_s4] ss:$0 sm:$0xff]  ;;  %v934_v23 = vld [vmem:[#allocation11 + $0x8] sm:$0xff] }
  0xd0   : > { %v1710_v16 = vpack.c.bf16 %v750_v15, %v749_v14  ;;  %v933_v22 = vld [vmem:[#allocation11] sm:$0xff]  ;;  %v935_v24 = vld [vmem:[#allocation11 + $0x10] sm:$0xff]  ;;  %v948_v62 = vld [vmem:[#allocation11 + $0x78] sm:$0xff] }
  0xd1   : > { %v1746_v25 = vpack.c.bf16 %v934_v23, %v933_v22  ;;  %v937_v28 = vld [vmem:[#allocation11 + $0x20] sm:$0xff]  ;;  %v939_v31 = vld [vmem:[#allocation11 + $0x30] sm:$0xff]  ;;  %v1034_v1 = vld [vmem:[#allocation12 + $0x8] sm:$0xff] }
  0xd2   : > { %1637 = vmatpush3.bf16.msra.mxu0 %v1634_v26  ;;  %1665 = vmatpush3.bf16.msra.mxu1 %v1662_v29  ;;  %v936_v26 = vld [vmem:[#allocation11 + $0x18] sm:$0xff]  ;;  %v938_v29 = vld [vmem:[#allocation11 + $0x28] sm:$0xff]  ;;  %v941_v34 = vld [vmem:[#allocation11 + $0x40] sm:$0xff] }
  0xd3   : > { %1639 = vmatprep.subr.bf16.mxu0 %v1638_v32  ;;  %1667 = vmatprep.subr.bf16.mxu1 %v1666_v35  ;;  %v1750_v27 = vpack.c.bf16 %v936_v26, %v935_v24  ;;  %v1754_v30 = vpack.c.bf16 %v938_v29, %v937_v28  ;;  %v943_v37 = vld [vmem:[#allocation11 + $0x50] sm:$0xff]  ;;  %v945_v40 = vld [vmem:[#allocation11 + $0x60] sm:$0xff]  ;;  %v1038_v14 = vld [vmem:[#allocation12 + $0x28] sm:$0xff] }
  0xd4   : > { %v1289_v43 = vld [vmem:[%s2612_s6] ss:$0 sm:$0xff]  ;;  %v1043_v22 = vld [vmem:[#allocation12 + $0x50] sm:$0xff]  ;;  %v1044_v23 = vld [vmem:[#allocation12 + $0x58] sm:$0xff] }
  0xd5   : > { %v1290_v56 = vld [vmem:[%s2647_s14] ss:$0 sm:$0xff]  ;;  %v1798_v24 = vpack.c.bf16 %v1044_v23, %v1043_v22  ;;  %v1046_v26 = vld [vmem:[#allocation12 + $0x68] sm:$0xff]  ;;  %v1047_v28 = vld [vmem:[#allocation12 + $0x70] sm:$0xff] }
  0xd6   : > { %1641 = vmatpush3.bf16.msra.mxu0 %v1638_v32  ;;  %1669 = vmatpush3.bf16.msra.mxu1 %v1666_v35  ;;  %v940_v32 = vld [vmem:[#allocation11 + $0x38] sm:$0xff]  ;;  %v942_v35 = vld [vmem:[#allocation11 + $0x48] sm:$0xff] }
  0xd7   : > { %1643 = vmatprep.subr.bf16.mxu0 %v1642_v38  ;;  %1671 = vmatprep.subr.bf16.mxu1 %v1670_v41  ;;  %v1758_v33 = vpack.c.bf16 %v940_v32, %v939_v31  ;;  %v1762_v36 = vpack.c.bf16 %v942_v35, %v941_v34  ;;  %v1048_v29 = vld [vmem:[#allocation12 + $0x78] sm:$0xff]  ;;  %v1291_v31 = vld [vmem:[%s2648_s16] ss:$0 sm:$0xff]  ;;  %s2093_s16 = sshll.u32 %s2177_s15, 4  ;;  %s2094_s16 = int_to_ptr.vmem [resolvable:$false] %s2093_s16 }
  0xd8   : > { %s2095_s12 = scalar_lea.vmem %s2094_s16, 512  ;;  %p2096_p13 = scmp.lt.s32.totalorder %s2557_s13, %s2094_s16 }
  0xd9   : > { %p2097_p0 = scmp.lt.s32.totalorder %s2095_s12, %s2089_s19 }
  0xda   : > { %1645 = vmatpush3.bf16.msra.mxu0 %v1642_v38  ;;  %1673 = vmatpush3.bf16.msra.mxu1 %v1670_v41  ;;  %v944_v38 = vld [vmem:[#allocation11 + $0x58] sm:$0xff]  ;;  %v946_v41 = vld [vmem:[#allocation11 + $0x68] sm:$0xff] }
  0xdb   : > { %1647 = vmatprep.subr.bf16.mxu0 %v1646_v44  ;;  %1675 = vmatprep.subr.bf16.mxu1 %v1674_v45  ;;  %v1766_v39 = vpack.c.bf16 %v944_v38, %v943_v37  ;;  %v1770_v42 = vpack.c.bf16 %v946_v41, %v945_v40  ;;  %v1292_v38 = vld [vmem:[%s2649_s7] ss:$0 sm:$0xff]  ;;  %p2098_p2 = por %p2097_p0, %p2096_p13 }
  0xdd   : > { %p2099_p8 = pnand %p2098_p2, %p2092_p1 }
  0xde   : > { %1649 = vmatpush3.bf16.msra.mxu0 %v1646_v44  ;;  %1677 = vmatpush3.bf16.msra.mxu1 %v1674_v45 }
  0xdf   : > { %1679 = vmatprep.subr.bf16.mxu1 %v1678_v49  ;;  %1683 = vmatprep.subr.bf16.mxu0 %v1682_v53 }
  0xe1   : > { %1441 = vmatmul.mubr.f32.vlgmr.msra.gmra.mrb[0].mxu0 %v536_v46 }
  0xe2   : > { %1681 = vmatpush3.bf16.msra.mxu1 %v1678_v49  ;;  %1685 = vmatpush3.bf16.msra.mxu0 %v1682_v53 }
  0xe3   : > { %1715 = vmatprep.subr.bf16.mxu1 %v1682_v53  ;;  %1687 = vmatprep.subr.bf16.mxu0 %v1686_v55 }
  0xe6   : > { %1689 = vmatpush3.bf16.msra.mxu0 %v1686_v55 }
  0xe7   : > { %1691 = vmatprep.subr.bf16.mxu0 %v1690_v58 }
  0xea   : > { %1693 = vmatpush3.bf16.msra.mxu0 %v1690_v58 }
  0xeb   : > { %1695 = vmatprep.subr.bf16.mxu0 %v1694_v61 }
  0xee   : > { %1697 = vmatpush3.bf16.msra.mxu0 %v1694_v61 }
  0xef   : > { %1699 = vmatprep.subr.bf16.mxu0 %v1698_v0 }
  0xf2   : > { %1701 = vmatpush3.bf16.msra.mxu0 %v1698_v0 }
  0xf3   : > { %1703 = vmatprep.subr.bf16.mxu0 %v1702_v3 }
  0xf6   : > { %1705 = vmatpush3.bf16.msra.mxu0 %v1702_v3 }
  0xf7   : > { %1707 = vmatprep.subr.bf16.mxu0 %v1706_v6 }
  0xfa   : > { %1709 = vmatpush3.bf16.msra.mxu0 %v1706_v6 }
  0xfb   : > { %1711 = vmatprep.subr.bf16.mxu0 %v1710_v16 }
  0xfe   : > { %1713 = vmatpush3.bf16.msra.mxu0 %v1710_v16 }
  0xff   : > { %1747 = vmatprep.subr.bf16.mxu0 %v1746_v25 }
 0x1b4   : > { %v1442_v8 = vpop.f32.mrb[0].mxu0 }
 0x1b5   : > { %v632_v9 = vadd.f32 %v1442_v8, %v1287_v7  ;;  %v626_v10 = vpop.f32.mrb[1].mxu0  ;;  %v1036_v8 = vld [vmem:[#allocation12 + $0x18] sm:$0xff] }
 0x1b6   : > { %v627_v11 = vadd.f32 %v1287_v7, %v626_v10  ;;  %v1035_v7 = vld [vmem:[#allocation12 + $0x10] sm:$0xff] }
 0x1b7   : > { %v636_v13 = vmax.f32 %v632_v9, 0.0 }
 0x1b8   : > { %v635_v12 = vmax.f32 %v627_v11, 0.0 }
 0x1ba   : > { %1475 = vmatprep.mubr.f32.mxu1 %v635_v12  ;;  %v1782_v12 = vpack.c.bf16 %v1036_v8, %v1035_v7 }
 0x1bb   : > { %1476 = vmatmul.mubr.f32.vlgmr.msra.gmra.mrb[0].mxu1 %v636_v13  ;;  %v1037_v13 = vld [vmem:[#allocation12 + $0x20] sm:$0xff] }
 0x1bc   : > { %1717 = vmatpush3.bf16.xpose.msra.mxu1 %v1682_v53  ;;  %v1786_v15 = vpack.c.bf16 %v1038_v14, %v1037_v13 }
 0x1bd   : > { %1719 = vmatprep.subr.bf16.mxu1 %v1686_v55 }
 0x1c4   : > { %1721 = vmatpush3.bf16.xpose.msra.mxu1 %v1686_v55 }
 0x1c5   : > { %1723 = vmatprep.subr.bf16.mxu1 %v1690_v58 }
 0x1cc   : > { %1725 = vmatpush3.bf16.xpose.msra.mxu1 %v1690_v58 }
 0x1cd   : > { %1727 = vmatprep.subr.bf16.mxu1 %v1694_v61 }
 0x1d4   : > { %1729 = vmatpush3.bf16.xpose.msra.mxu1 %v1694_v61  ;;  %v947_v61 = vld [vmem:[#allocation11 + $0x70] sm:$0xff] }
 0x1d5   : > { %1731 = vmatprep.subr.bf16.mxu1 %v1698_v0  ;;  %v1774_v63 = vpack.c.bf16 %v948_v62, %v947_v61 }
 0x1dc   : > { %1733 = vmatpush3.bf16.xpose.msra.mxu1 %v1698_v0  ;;  %v1033_v0 = vld [vmem:[#allocation12] sm:$0xff] }
 0x1dd   : > { %1735 = vmatprep.subr.bf16.mxu1 %v1702_v3  ;;  %v1778_v2 = vpack.c.bf16 %v1034_v1, %v1033_v0 }
 0x1e4   : > { %1737 = vmatpush3.bf16.xpose.msra.mxu1 %v1702_v3  ;;  %v928_v3 = vstv %s927_s23  ;;  %s2650_s23 = sld [smem:[#allocation24_spill]] }
 0x1e5   : > { %1739 = vmatprep.subr.bf16.mxu1 %v1706_v6 }
 0x1ea   : > { %s2562_s26 = scalar_lea.hbm %s2650_s23, %s1299_s20 }
 0x1ec   : > { %1741 = vmatpush3.bf16.xpose.msra.mxu1 %v1706_v6 }
 0x1ed   : > { %1743 = vmatprep.subr.bf16.mxu1 %v1710_v16 }
 0x1f4   : > { %1745 = vmatpush3.bf16.xpose.msra.mxu1 %v1710_v16  ;;  %v1039_v16 = vld [vmem:[#allocation12 + $0x30] sm:$0xff] }
 0x28e   : > { %v1477_v18 = vpop.f32.mrb[0].mxu1 }
 0x28f   : > { %v726_v19 = vpop.f32.mrb[1].mxu1  ;;  %v2536_v21 = vadd.f32 %v1477_v18, %v1288_v17 }
 0x290   : > { %v2534_v20 = vadd.f32 %v1288_v17, %v726_v19  ;;  %v1040_v17 = vld [vmem:[#allocation12 + $0x38] sm:$0xff]  ;;  %v1041_v19 = vld [vmem:[#allocation12 + $0x40] sm:$0xff] }
 0x291   : > { %v930_v4 = vmul.f32 %v928_v3, %v2536_v21  ;;  %v1790_v18 = vpack.c.bf16 %v1040_v17, %v1039_v16 }
 0x292   : > { %1510 = vmatprep.mubr.f32.mxu0 %v2534_v20  ;;  %v929_v6 = vmul.f32 %v928_v3, %v2534_v20  ;;  %v1042_v20 = vld [vmem:[#allocation12 + $0x48] sm:$0xff] }
 0x293   : > { %1511 = vmatmul.mubr.f32.vlgmr.msra.gmra.mrb[2].mxu0 %v2536_v21  ;;  %v1794_v21 = vpack.c.bf16 %v1042_v20, %v1041_v19 }
 0x294   : > { %1749 = vmatpush3.bf16.msra.mxu0 %v1746_v25  ;;  %v1045_v25 = vld [vmem:[#allocation12 + $0x60] sm:$0xff] }
 0x295   : > { %1751 = vmatprep.subr.bf16.mxu0 %v1750_v27 }
 0x298   : > { %1753 = vmatpush3.bf16.msra.mxu0 %v1750_v27  ;;  %v1802_v27 = vpack.c.bf16 %v1046_v26, %v1045_v25 }
 0x299   : > { %1755 = vmatprep.subr.bf16.mxu0 %v1754_v30 }
 0x29c   : > { %1757 = vmatpush3.bf16.msra.mxu0 %v1754_v30  ;;  %v1806_v30 = vpack.c.bf16 %v1048_v29, %v1047_v28 }
 0x29d   : > { %1759 = vmatprep.subr.bf16.mxu0 %v1758_v33 }
 0x2a0   : > { %1761 = vmatpush3.bf16.msra.mxu0 %v1758_v33 }
 0x2a1   : > { %1763 = vmatprep.subr.bf16.mxu0 %v1762_v36 }
 0x2a4   : > { %1765 = vmatpush3.bf16.msra.mxu0 %v1762_v36 }
 0x2a5   : > { %1767 = vmatprep.subr.bf16.mxu0 %v1766_v39 }
 0x2a8   : > { %1769 = vmatpush3.bf16.msra.mxu0 %v1766_v39 }
 0x2a9   : > { %1771 = vmatprep.subr.bf16.mxu0 %v1770_v42 }
 0x2ac   : > { %1773 = vmatpush3.bf16.msra.mxu0 %v1770_v42 }
 0x2ad   : > { %1775 = vmatprep.subr.bf16.mxu0 %v1774_v63 }
 0x2b0   : > { %1777 = vmatpush3.bf16.msra.mxu0 %v1774_v63 }
 0x2b1   : > { %1779 = vmatprep.subr.bf16.mxu0 %v1778_v2 }
 0x366   : > { %v1512_v44 = vpop.f32.mrb[2].mxu0 }
 0x367   : > { %v830_v45 = vadd.f32 %v1512_v44, %v1289_v43  ;;  %v824_v46 = vpop.f32.mrb[3].mxu0 }
 0x368   : > { %v825_v47 = vadd.f32 %v1289_v43, %v824_v46 }
 0x369   : > { %v834_v48 = vsub.f32 0.0, %v830_v45 }
 0x36a   : > { %v833_v49 = vsub.f32 0.0, %v825_v47 }
 0x36b   : > { %v837_v50 = vmul.f32 1.442695, %v834_v48 }
 0x36c   : > { %v835_v51 = vmul.f32 1.442695, %v833_v49 }
 0x36d   : > { %1911 = vpow2.f32 %v837_v50 }
 0x36e   : > { %1913 = vpow2.f32 %v835_v51 }
 0x377   : > { %v1912_v52 = vpop.eup %1911 }
 0x378   : > { %v1914_v53 = vpop.eup %1913  ;;  %v840_v54 = vadd.f32 1.0, %v1912_v52 }
 0x379   : > { %v839_v55 = vadd.f32 1.0, %v1914_v53 }
 0x37a   : > { %1915 = vrcp.f32 %v840_v54 }
 0x37b   : > { %1917 = vrcp.f32 %v839_v55 }
 0x384   : > { %v1916_v57 = vpop.eup %1915 }
 0x385   : > { %v1918_v58 = vpop.eup %1917  ;;  %v851_v60 = vmul.f32 %v1916_v57, %v1290_v56 }
 0x386   : > { %v850_v59 = vmul.f32 %v1918_v58, %v1290_v56 }
 0x388   : > { %1545 = vmatprep.mubr.f32.mxu1 %v850_v59 }
 0x389   : > { %1546 = vmatmul.mubr.f32.vlgmr.msra.gmra.mrb[2].mxu1 %v851_v60 }
 0x45c   : > { %v1547_v5 = vpop.f32.mrb[2].mxu1 }
 0x45d   : > { %v932_v9 = vadd.f32 %v1547_v5, %v930_v4  ;;  %v918_v10 = vpop.f32.mrb[3].mxu1 }
 0x45e   : > { %v931_v11 = vadd.f32 %v929_v6, %v918_v10 }
 0x460   : > { %1580 = vmatprep.mubr.f32.mxu0 %v931_v11 }
 0x461   : > { %1581 = vmatmul.mubr.f32.vlgmr.msra.gmra.mrb[4].mxu0 %v932_v9 }
 0x462   : > { %1781 = vmatpush3.bf16.msra.mxu0 %v1778_v2 }
 0x463   : > { %1783 = vmatprep.subr.bf16.mxu0 %v1782_v12 }
 0x466   : > { %1785 = vmatpush3.bf16.msra.mxu0 %v1782_v12 }
 0x467   : > { %1787 = vmatprep.subr.bf16.mxu0 %v1786_v15 }
 0x46a   : > { %1789 = vmatpush3.bf16.msra.mxu0 %v1786_v15 }
 0x46b   : > { %1791 = vmatprep.subr.bf16.mxu0 %v1790_v18 }
 0x46e   : > { %1793 = vmatpush3.bf16.msra.mxu0 %v1790_v18 }
 0x46f   : > { %1795 = vmatprep.subr.bf16.mxu0 %v1794_v21 }
 0x472   : > { %1797 = vmatpush3.bf16.msra.mxu0 %v1794_v21 }
 0x473   : > { %1799 = vmatprep.subr.bf16.mxu0 %v1798_v24 }
 0x476   : > { %1801 = vmatpush3.bf16.msra.mxu0 %v1798_v24 }
 0x477   : > { %1803 = vmatprep.subr.bf16.mxu0 %v1802_v27 }
 0x47a   : > { %1805 = vmatpush3.bf16.msra.mxu0 %v1802_v27 }
 0x47b   : > { %1807 = vmatprep.subr.bf16.mxu0 %v1806_v30 }
 0x47e   : > { %1809 = vmatpush3.bf16.msra.mxu0 %v1806_v30 }
 0x534   : > { %v1582_v32 = vpop.f32.mrb[4].mxu0 }
 0x535   : > { %v1028_v33 = vadd.f32 %v1582_v32, %v1291_v31  ;;  %v1022_v34 = vpop.f32.mrb[5].mxu0 }
 0x536   : > { %v1023_v35 = vadd.f32 %v1291_v31, %v1022_v34 }
 0x537   : > { %v1032_v37 = vmax.f32 %v1028_v33, 0.0 }
 0x538   : > { %v1031_v36 = vmax.f32 %v1023_v35, 0.0 }
 0x53a   : > { %1615 = vmatprep.mubr.f32.mxu0 %v1031_v36 }
 0x53b   : > { %1616 = vmatmul.mubr.f32.vlgmr.msra.gmra.mrb[6].mxu0 %v1032_v37 }
 0x60e   : > { %v1617_v39 = vpop.f32.mrb[6].mxu0 }
 0x60f   : > { %v1128_v40 = vadd.f32 %v1617_v39, %v1292_v38  ;;  %v1122_v41 = vpop.f32.mrb[7].mxu0 }
 0x610   : > { %v1123_v42 = vadd.f32 %v1292_v38, %v1122_v41 }
 0x611   : > { %1132 = vst [vmem:[%s532_s24 + $0x8] sm:$0xff] %v1128_v40 }
 0x612   : > { %1131 = vst [vmem:[%s532_s24] sm:$0xff] %v1123_v42 }
 0x613   : > { %2102 = shalt.err (!%p2099_p8)
}
 0x614   : > { %s2103_s24 = scalar_lea.hbm %s2562_s26, 256  ;;  %s2107_s20 = scalar_lea.hbm %s2650_s23, 512 }
 0x615   : > { %p2104_p6 = scmp.ne.s32.totalorder %s2562_s26, %s2103_s24  ;;  %p2108_p3 = scmp.lt.u32.totalorder %s2562_s26, %s2650_s23 }
 0x616   : > { %p2109_p5 = scmp.lt.u32.totalorder %s2107_s20, %s2103_s24  ;;  %p2111_p7 = scmp.lt.u32.totalorder %s2103_s24, %s2562_s26 }
 0x617   : > { %p2105_p10 = pnand %p2104_p6, %p2651_p4 }
 0x618   : > { %p2110_p9 = por %p2109_p5, %p2108_p3 }
 0x619   : > { %p2106_p11 = pneg %p2105_p10 }
 0x61a   : > { %p2112_p12 = por %p2111_p7, %p2110_p9 }
 0x61c   : > { %p2113_p1 = pnand %p2112_p12, %p2106_p11 }
 0x61e   : > { %2116 = shalt.err (!%p2113_p1)
}
 0x61f   : > { %s2178_s19 = smov 128   ;;  %s2179_s15 = smov 8  }
 0x620   : > { %1832 = dma.vmem_to_hbm [thread:$0]  (%p2651_p4), %s2557_s13, 256, %s2562_s26, %s1134_s21, %s2178_s19, %s2178_s19, %s2179_s15  }
 0x621 PF: > { %s1162_s16 = sand.u32 1, %s2155_s27   ;;  %p2652_p13 = scmp.ne.s32.totalorder %s2637_s17, 0 }
 0x622   : > { %p2653_p0 = scmp.ge.s32.totalorder %s2167_s30, 2  ;;  %s1163_s12 = scalar_lea.sflag [#allocation5], %s1162_s16 }
 0x624   : > { %p1855_p2 = pnand %p2653_p0, %p2652_p13 }
 0x626   : > { %2150 = dma.done.wait (!%p1855_p2), %s1163_s12, 256  }
 0x627   : > { %2152 = vsyncadd (!%p1855_p2), %s1163_s12, 4294967040  ;;  %p30_p8 = scmp.ge.s32.totalorder %s2426_s8, 4   ;;  %s2654_s27 = smov %s2159_s28 }
 0x628   : > { %s2655_s28 = smov %s2163_s29  ;;  %s2656_s29 = smov %s2438_s10 }
 0x629   : > { %s2657_s30 = smov %s2426_s8  ;;  %32 = sbr.rel (!%p30_p8) target bundleno = 15 (0xf), region = 137 }
 0x630   :  { %1168 = vsyncpa [#allocation4], 1 }
 0x631   :  { %1170 = vsyncpa [#allocation4 + $0x1], 1 }
 0x632   :  { %1171 = vsyncpa [#allocation7], 1 }
 0x633   :  { %1172 = vsyncpa [#allocation10], 1 }
 0x634   :  { %1173 = vsyncpa [#allocation13], 1 }
 0x635   :  { %1174 = vsyncpa [#allocation5], 1 }
 0x636   :  { %1176 = vsyncpa [#allocation5 + $0x1], 1 }

</bundles_post_ra>
